<compile_context>
chip_gen: v6e
topology: v6e:2x2x1
jax: 0.10.0
libtpu: 0.0.40
codegen_flags: <defaults>
</compile_context>

<pallas_src>
import math
import functools

import jax
import jax.numpy as jnp
from jax.experimental import pallas as pl
from jax.experimental.pallas import tpu as pltpu


# ----------------------------- Pallas kernel --------------------------------
def _decoder_kernel(cur_ref, qf_ref, kt_ref, vt_ref, shk_ref, mask_ref,
                    wq_ref, wc_ref, bc_ref, logit_ref, sel_ref,
                    *, head_num, qkv_dim, embedding_dim, logit_clipping):
    H, D, E = head_num, qkv_dim, embedding_dim
    Bblk, P, Np = mask_ref.shape
    NEG = -1e30                                     # finite "-inf" (bf16/f32 safe)

    mask = mask_ref[...] != 0                       # (Bblk, P, Np) True => forbidden
    cur = cur_ref[...]                              # (Bblk, P, 1) int32
    col = jax.lax.broadcasted_iota(jnp.int32, (Bblk, P, Np), 2)

    shk = shk_ref[...]                              # (Bblk, E, Np) bf16, lane-dense

    # In-kernel gather of encoded_last_node via a one-hot MXU matmul (no HBM gather).
    onehot = (col == cur).astype(shk.dtype)         # (Bblk, P, Np)
    el = jnp.einsum('bpn,ben->bpe', onehot, shk,
                    preferred_element_type=jnp.float32).astype(shk.dtype)
    el2 = el.reshape(Bblk * P, E)                   # (Bblk*P, E) bf16

    inv_sqrt_d = 1.0 / math.sqrt(D)
    mh2 = jnp.zeros((Bblk * P, E), jnp.float32)     # multi_head_combine accumulator

    # ---- multi-head attention: heads statically unrolled, batched over Bblk ----
    for h in range(H):
        kt_h = kt_ref[h]                            # (Bblk, D, Np) bf16
        vt_h = vt_ref[h]                            # (Bblk, D, Np) bf16
        wq_h = wq_ref[h]                            # (E, D) bf16
        wc_h = wc_ref[h]                            # (D, E) bf16

        q_h = qf_ref[h].astype(jnp.float32) + jnp.dot(
            el2, wq_h, preferred_element_type=jnp.float32).reshape(Bblk, P, D)

        s = jnp.einsum('bpd,bdn->bpn', q_h.astype(kt_h.dtype), kt_h,
                       preferred_element_type=jnp.float32) * inv_sqrt_d
        s = jnp.where(mask, NEG, s)
        m = jnp.max(s, axis=-1, keepdims=True)
        p = jnp.exp(s - m)
        attn = (p * pl.reciprocal(jnp.sum(p, axis=-1, keepdims=True),
                                  approx=True)).astype(vt_h.dtype)
        o_h = jnp.einsum('bpn,bdn->bpd', attn, vt_h,
                         preferred_element_type=jnp.float32)        # (Bblk, P, D) f32

        # accumulate the combine directly per head (no concat scratch, no lane-masked stores)
        mh2 = mh2 + jnp.dot(o_h.reshape(Bblk * P, D).astype(wc_h.dtype), wc_h,
                            preferred_element_type=jnp.float32)

    mh3 = (mh2 + bc_ref[...].astype(jnp.float32)).reshape(Bblk, P, E)

    # ---- single-head scoring against encoded nodes (N lane-dense) ----
    score = jnp.einsum('bpe,ben->bpn', mh3.astype(shk.dtype), shk,
                       preferred_element_type=jnp.float32)          # (Bblk, P, Np)
    score_clipped = logit_clipping * jnp.tanh(score * (1.0 / math.sqrt(E)))
    logits = jnp.where(mask, NEG, score_clipped)                     # mask applied again
    logit_ref[...] = logits.astype(logit_ref.dtype)

    # fused argmax (first index of the row maximum)
    maxv = jnp.max(logits, axis=-1, keepdims=True)
    sel = jnp.min(jnp.where(logits >= maxv, col, Np), axis=-1, keepdims=True)
    sel_ref[...] = sel.astype(jnp.int32)


def decoder_forward_pallas(current_node, q_first, k_t, v_t, single_head_key, mask_i8,
                           W_q_last_h, W_comb_h, b_comb,
                           *, head_num, logit_clipping, block_b=64):
    """current_node: (B, P) int; q_first: (H, B, P, D) bf16; k_t/v_t: (H, B, D, Np) bf16;
    single_head_key: (B, E, Np) bf16; mask_i8: (B, P, N) int8 (1 = forbidden).
    Returns (logits (B, P, N) bf16, selected (B, P) int32)."""
    H, Bk, D, Np = k_t.shape
    B, P, N = mask_i8.shape
    E = H * D
    Pp = ((P + 7) // 8) * 8

    # lane-pad mask to Np with 1 (forbidden) so padded key columns never contribute/win
    if Np > N:
        mask_i8 = jnp.pad(mask_i8, ((0, 0), (0, 0), (0, Np - N)), constant_values=1)
    if Pp > P:
        mask_i8 = jnp.pad(mask_i8, ((0, 0), (0, Pp - P), (0, 0)))
        q_first = jnp.pad(q_first, ((0, 0), (0, 0), (0, Pp - P), (0, 0)))
        current_node = jnp.pad(current_node, ((0, 0), (0, Pp - P)))
    cur = current_node.astype(jnp.int32)[:, :, None]                 # (B, Pp, 1)

    # --- per-batch-element VMEM footprint (bytes) to size the batch block ---
    bytes_per_b = (2 * H * D * Np * 2        # K^T + V^T (bf16)
                   + E * Np * 2              # single_head_key (bf16)
                   + Pp * Np                 # mask (int8)
                   + H * Pp * D * 2          # q_first (bf16)
                   + Pp * 4                  # current node (int32)
                   + Pp * Np * 2             # logits out (bf16)
                   + Pp * 4)                 # selected out (int32)
    budget = 10 << 20                        # single-copy target (~2x with double buffering)
    Bblk = max(1, min(block_b, B, budget // max(bytes_per_b, 1)))
    if Bblk >= B and B > 1:
        Bblk = (B + 1) // 2                  # keep >=2 grid steps: feed both v7x TensorCores
    Bp = pl.cdiv(B, Bblk) * Bblk

    if Bp > B:
        pb = Bp - B
        mask_i8 = jnp.pad(mask_i8, ((0, pb), (0, 0), (0, 0)))
        cur = jnp.pad(cur, ((0, pb), (0, 0), (0, 0)))
        q_first = jnp.pad(q_first, ((0, 0), (0, pb), (0, 0), (0, 0)))
        k_t = jnp.pad(k_t, ((0, 0), (0, pb), (0, 0), (0, 0)))
        v_t = jnp.pad(v_t, ((0, 0), (0, pb), (0, 0), (0, 0)))
        single_head_key = jnp.pad(single_head_key, ((0, pb), (0, 0), (0, 0)))

    w_bytes = 2 * H * E * D * 2 + E * 4
    vmem_need = 2 * Bblk * bytes_per_b + 2 * w_bytes + (2 << 20)
    vmem_limit = int(min(max(vmem_need, 16 << 20), 48 << 20))        # <=48MiB: safe on v7x

    kernel = functools.partial(
        _decoder_kernel,
        head_num=H, qkv_dim=D, embedding_dim=E, logit_clipping=logit_clipping,
    )

    logits_p, sel_p = pl.pallas_call(
        kernel,
        out_shape=(jax.ShapeDtypeStruct((Bp, Pp, Np), jnp.bfloat16),
                   jax.ShapeDtypeStruct((Bp, Pp, 1), jnp.int32)),
        grid=(Bp // Bblk,),
        in_specs=[
            pl.BlockSpec((Bblk, Pp, 1), lambda b: (b, 0, 0)),          # current node (int32)
            pl.BlockSpec((H, Bblk, Pp, D), lambda b: (0, b, 0, 0)),    # q_first (head-major)
            pl.BlockSpec((H, Bblk, D, Np), lambda b: (0, b, 0, 0)),    # K^T (N lane-dense)
            pl.BlockSpec((H, Bblk, D, Np), lambda b: (0, b, 0, 0)),    # V^T (N lane-dense)
            pl.BlockSpec((Bblk, E, Np), lambda b: (b, 0, 0)),          # single_head_key
            pl.BlockSpec((Bblk, Pp, Np), lambda b: (b, 0, 0)),         # mask (int8)
            pl.BlockSpec((H, E, D), lambda b: (0, 0, 0)),              # W_q_last (per head)
            pl.BlockSpec((H, D, E), lambda b: (0, 0, 0)),              # W_comb (per head)
            pl.BlockSpec((1, E), lambda b: (0, 0)),                    # combine bias (f32)
        ],
        out_specs=(pl.BlockSpec((Bblk, Pp, Np), lambda b: (b, 0, 0)),
                   pl.BlockSpec((Bblk, Pp, 1), lambda b: (b, 0, 0))),
        compiler_params=pltpu.CompilerParams(
            dimension_semantics=("parallel",),
            vmem_limit_bytes=vmem_limit),
    )(cur, q_first, k_t, v_t, single_head_key, mask_i8, W_q_last_h, W_comb_h, b_comb)

    return logits_p[:B, :P, :N], sel_p[:B, :P, 0]


# ----------------------------- Plain-JAX glue --------------------------------
def reshape_by_heads(qkv, head_num):
    # (B, n, H*D) -> (B, H, n, D)
    B, n, HD = qkv.shape
    return qkv.reshape(B, n, head_num, HD // head_num).transpose(0, 2, 1, 3)


def init_params(key, embedding_dim, head_num):
    E = embedding_dim
    ks = jax.random.split(key, 6)
    scale = 0.1
    return {
        "coord_embedding": scale * jax.random.normal(ks[0], (E, 2), jnp.float32),  # (out, in)
        "W_q_first": scale * jax.random.normal(ks[1], (E, E), jnp.float32),
        "W_q_last": scale * jax.random.normal(ks[2], (E, E), jnp.float32),
        "W_kv": scale * jax.random.normal(ks[3], (2 * E, E), jnp.float32),
        "W_comb": scale * jax.random.normal(ks[4], (E, E), jnp.float32),
        "b_comb": scale * jax.random.normal(ks[5], (1, E), jnp.float32),
    }


def encoder_forward(params, coords):
    # TSP_Encoder: coord_embedding (Linear(2, E, bias=False)).
    # TODO(synk): GTLayer encoder layers and dist_embedding are not defined in the
    # reference source; the encoder here is the coordinate embedding only.
    return jnp.dot(coords, params["coord_embedding"].T)


def set_kv(params, encoded_nodes, head_num):
    """Returns K^T, V^T as (H, B, D, Npad) bf16 and single_head_key as (B, E, Npad) bf16,
    with N padded to a multiple of 128 (lane-dense; built once per rollout)."""
    B, N, E = encoded_nodes.shape
    D = E // head_num
    kv = jnp.dot(encoded_nodes, params["W_kv"].T)                    # (B, N, 2E)
    k_flat, v_flat = kv[..., :E], kv[..., E:]
    k_t = k_flat.reshape(B, N, head_num, D).transpose(2, 0, 3, 1)    # (H, B, D, N)
    v_t = v_flat.reshape(B, N, head_num, D).transpose(2, 0, 3, 1)    # (H, B, D, N)
    shk = jnp.swapaxes(encoded_nodes, 1, 2)                          # (B, E, N)

    Np = ((N + 127) // 128) * 128
    if Np > N:
        pad = Np - N
        k_t = jnp.pad(k_t, ((0, 0), (0, 0), (0, 0), (0, pad)))
        v_t = jnp.pad(v_t, ((0, 0), (0, 0), (0, 0), (0, pad)))
        shk = jnp.pad(shk, ((0, 0), (0, 0), (0, pad)))
    return (k_t.astype(jnp.bfloat16), v_t.astype(jnp.bfloat16), shk.astype(jnp.bfloat16))


def set_q1(params, encoded_q1, head_num):
    # head-major (H, B, P, D) bf16 so per-head picks are leading-axis indexing in-kernel
    B, P, E = encoded_q1.shape
    D = E // head_num
    q = jnp.dot(encoded_q1, params["W_q_first"].T)                   # (B, P, E) f32
    return q.reshape(B, P, head_num, D).transpose(2, 0, 1, 3).astype(jnp.bfloat16)


def prep_decoder_weights(params, head_num):
    """Per-head bf16 decoder weights: W_q_last^T as (H, E, D), W_comb^T as (H, D, E)."""
    E = params["W_q_last"].shape[1]
    D = E // head_num
    wq_h = params["W_q_last"].T.reshape(E, head_num, D).transpose(1, 0, 2)
    wc_h = params["W_comb"].T.reshape(head_num, D, E)
    return wq_h.astype(jnp.bfloat16), wc_h.astype(jnp.bfloat16)


def tsp_model_step(cache, current_node, ninf_mask, *, head_num, logit_clipping):
    """TSPModel.forward, current_node-is-not-None branch (deterministic=True,
    use_memory=False). ninf_mask may be the torch-style additive -inf float mask or
    an int8 visited-mask (1 = forbidden)."""
    k_t, v_t, shk, q_first, wq_h, wc_h, b_comb = cache
    if jnp.issubdtype(ninf_mask.dtype, jnp.floating):
        mask_i8 = jnp.where(jnp.isfinite(ninf_mask), 0, 1).astype(jnp.int8)
    else:
        mask_i8 = ninf_mask.astype(jnp.int8)

    # TODO(synk): use_memory=True branch (MLP_swiglu mem_FF / edge_memory gather) is
    # not defined in the reference source and is not implemented.
    logits, selected = decoder_forward_pallas(
        current_node, q_first, k_t, v_t, shk, mask_i8, wq_h, wc_h, b_comb,
        head_num=head_num, logit_clipping=logit_clipping)
    # deterministic=True -> argmax (fused in-kernel); prob = None
    # TODO(synk): the deterministic=False multinomial-sampling branch is host/RNG glue
    # and is left to plain JAX outside the kernel.
    return selected, logits


# ------------------------- pure-JAX reference (validation) -------------------
def decoder_step_ref(params, encoded_nodes, encoded_last_node, q_first_flat,
                     ninf_mask, *, head_num, logit_clipping):
    B, N, E = encoded_nodes.shape
    D = E // head_num
    kv = jnp.dot(encoded_nodes, params["W_kv"].T)
    k = reshape_by_heads(kv[..., :E], head_num)                       # (B, H, N, D)
    v = reshape_by_heads(kv[..., E:], head_num)
    q_last = reshape_by_heads(jnp.dot(encoded_last_node, params["W_q_last"].T), head_num)
    q = reshape_by_heads(q_first_flat, head_num) + q_last             # (B, H, P, D)
    s = jnp.einsum('bhpd,bhnd->bhpn', q, k) / math.sqrt(D) + ninf_mask[:, None]
    a = jax.nn.softmax(s, axis=-1)
    out = jnp.einsum('bhpn,bhnd->bhpd', a, v)                         # (B, H, P, D)
    out_concat = out.transpose(0, 2, 1, 3).reshape(B, -1, E)
    mh = jnp.dot(out_concat, params["W_comb"].T) + params["b_comb"][0]
    score = jnp.einsum('bpe,bne->bpn', mh, encoded_nodes)
    score_clipped = logit_clipping * jnp.tanh(score / math.sqrt(E))
    return score_clipped + ninf_mask


# ----------------------------------- main ------------------------------------
if __name__ == "__main__":
    B, P, N = 2, 8, 8          # batch, pomo, problem size
    E, H = 32, 4               # embedding_dim, head_num
    LOGIT_CLIP = 10.0

    key = jax.random.PRNGKey(0)
    k_par, k_coord, k_node = jax.random.split(key, 3)

    params = init_params(k_par, E, H)
    coords = jax.random.uniform(k_coord, (B, N, 2), jnp.float32)

    # pre_forward
    encoded_nodes = encoder_forward(params, coords)                   # (B, N, E) f32
    k_t, v_t, shk = set_kv(params, encoded_nodes, H)                  # bf16, N padded
    wq_h, wc_h = prep_decoder_weights(params, H)                      # per-head bf16

    # first forward call (current_node is None): selects arange + sets q_first
    selected0 = jnp.broadcast_to(jnp.arange(P)[None, :] % N, (B, P))
    idx0 = jnp.broadcast_to(selected0[:, :, None], (B, P, E))
    encoded_first_node = jnp.take_along_axis(encoded_nodes, idx0, axis=1)
    q_first_flat = jnp.dot(encoded_first_node, params["W_q_first"].T)  # f32 (for reference)
    q_first = set_q1(params, encoded_first_node, H)                     # (H, B, P, D) bf16

    # second forward call (current_node given): Pallas decoder kernel
    current_node = jax.random.randint(k_node, (B, P), 0, N, jnp.int32)
    node_ids = jnp.arange(N)[None, None, :]
    ninf_mask = jnp.where(node_ids == current_node[:, :, None],
                          -jnp.inf, 0.0).astype(jnp.float32)          # (B, P, N)

    # TODO(synk): K/V/single_head_key are rollout-invariant; a multi-step persistent
    # kernel that keeps them VMEM-resident across decode steps is a further optimization
    # not implemented here (each step's mask depends on the previous selection).
    cache = (k_t, v_t, shk, q_first, wq_h, wc_h, params["b_comb"])
    selected, logits = tsp_model_step(cache, current_node, ninf_mask,
                                      head_num=H, logit_clipping=LOGIT_CLIP)
    jax.block_until_ready((selected, logits))

    # validate against a plain-JAX f32 reference of the torch decoder
    idx = jnp.broadcast_to(current_node[:, :, None], (B, P, E))
    encoded_last_node = jnp.take_along_axis(encoded_nodes, idx, axis=1)
    logits_ref = decoder_step_ref(params, encoded_nodes, encoded_last_node, q_first_flat,
                                  ninf_mask, head_num=H, logit_clipping=LOGIT_CLIP)
    valid = jnp.isfinite(ninf_mask)
    logits_f32 = logits.astype(jnp.float32)
    max_diff = jnp.max(jnp.abs(jnp.where(valid, logits_f32 - logits_ref, 0.0)))

    assert selected.shape == (B, P)
    assert logits.shape == (B, P, N)
    assert bool(jnp.all(jnp.isfinite(jnp.where(valid, logits_f32, 0.0))))
    assert bool(jnp.all((selected >= 0) & (selected < N)))
    sel_mask = jnp.take_along_axis(ninf_mask, selected[:, :, None], axis=2)[:, :, 0]
    assert bool(jnp.all(jnp.isfinite(sel_mask)))        # argmax never picks a masked node
    assert float(max_diff) < 5e-2, f"mismatch vs reference: {float(max_diff)}"
    print("KERNEL_OK")
</pallas_src>

<mosaic_0001>
module attributes {stable_mosaic.version = 11 : i64} {
  func.func @_decoder_kernel(%arg0: i32, %arg1: memref<1x8x1xi32, #tpu.memory_space<vmem>>, %arg2: memref<4x1x8x8xbf16, #tpu.memory_space<vmem>>, %arg3: memref<4x1x8x128xbf16, #tpu.memory_space<vmem>>, %arg4: memref<4x1x8x128xbf16, #tpu.memory_space<vmem>>, %arg5: memref<1x32x128xbf16, #tpu.memory_space<vmem>>, %arg6: memref<1x8x128xi8, #tpu.memory_space<vmem>>, %arg7: memref<4x32x8xbf16, #tpu.memory_space<vmem>>, %arg8: memref<4x8x32xbf16, #tpu.memory_space<vmem>>, %arg9: memref<1x32xf32, #tpu.memory_space<vmem>>, %arg10: memref<1x8x128xbf16, #tpu.memory_space<vmem>>, %arg11: memref<1x8x1xi32, #tpu.memory_space<vmem>>) attributes {dimension_semantics = [#tpu.dimension_semantics<parallel>], iteration_bounds = array<i64: 2>, scalar_prefetch = 0 : i64, scratch_operands = 0 : i64, tpu.core_type = #tpu.core_type<tc>, window_params = [{transform_indices = @transform_0, window_bounds = array<i64: 1, 8, 1>}, {transform_indices = @transform_1, window_bounds = array<i64: 4, 1, 8, 8>}, {transform_indices = @transform_2, window_bounds = array<i64: 4, 1, 8, 128>}, {transform_indices = @transform_3, window_bounds = array<i64: 4, 1, 8, 128>}, {transform_indices = @transform_4, window_bounds = array<i64: 1, 32, 128>}, {transform_indices = @transform_5, window_bounds = array<i64: 1, 8, 128>}, {pipeline_mode = #tpu.pipeline_mode<synchronous>, transform_indices = @transform_6, window_bounds = array<i64: 4, 32, 8>}, {pipeline_mode = #tpu.pipeline_mode<synchronous>, transform_indices = @transform_7, window_bounds = array<i64: 4, 8, 32>}, {pipeline_mode = #tpu.pipeline_mode<synchronous>, transform_indices = @transform_8, window_bounds = array<i64: 1, 32>}, {transform_indices = @transform_9, window_bounds = array<i64: 1, 8, 128>}, {transform_indices = @transform_10, window_bounds = array<i64: 1, 8, 1>}]} {
    %c0 = arith.constant 0 : index
    %c0_0 = arith.constant 0 : index
    %c0_1 = arith.constant 0 : index
    %0 = vector.load %arg6[%c0, %c0_0, %c0_1] : memref<1x8x128xi8, #tpu.memory_space<vmem>>, vector<1x8x128xi8>
    %c0_i8 = arith.constant 0 : i8
    %1 = vector.broadcast %c0_i8 : i8 to vector<1x8x128xi8>
    %2 = arith.cmpi ne, %0, %1 : vector<1x8x128xi8>
    %c0_2 = arith.constant 0 : index
    %c0_3 = arith.constant 0 : index
    %c0_4 = arith.constant 0 : index
    %3 = vector.load %arg1[%c0_2, %c0_3, %c0_4] : memref<1x8x1xi32, #tpu.memory_space<vmem>>, vector<1x8x1xi32>
    %4 = tpu.iota {dimensions = array<i32: 2>} : vector<1x8x128xi32>
    %c0_5 = arith.constant 0 : index
    %c0_6 = arith.constant 0 : index
    %c0_7 = arith.constant 0 : index
    %5 = vector.load %arg5[%c0_5, %c0_6, %c0_7] : memref<1x32x128xbf16, #tpu.memory_space<vmem>>, vector<1x32x128xbf16>
    %6 = vector.broadcast %3 : vector<1x8x1xi32> to vector<1x8x128xi32>
    %7 = arith.cmpi eq, %4, %6 : vector<1x8x128xi32>
    %8 = arith.extui %7 : vector<1x8x128xi1> to vector<1x8x128xi32>
    %9 = arith.sitofp %8 : vector<1x8x128xi32> to vector<1x8x128xf32>
    %10 = arith.truncf %9 : vector<1x8x128xf32> to vector<1x8x128xbf16>
    "tpu.trace_start"() <{level = 10 : i32, message = "bpn,ben->bpe"}> : () -> ()
    %cst = arith.constant dense<0.000000e+00> : vector<1x8x32xf32>
    %11 = tpu.matmul %10, %5, %cst {dimension_numbers = #tpu.dot_dimension_numbers<[2], [2], [1], [1], [0, 0, 0, 1, 1, 1], [0], [0]>} : vector<1x8x128xbf16>, vector<1x32x128xbf16>, vector<1x8x32xf32> -> vector<1x8x32xf32>
    "tpu.trace_stop"() : () -> ()
    %12 = arith.truncf %11 : vector<1x8x32xf32> to vector<1x8x32xbf16>
    %13 = vector.shape_cast %12 : vector<1x8x32xbf16> to vector<8x32xbf16>
    %cst_8 = arith.constant 0.000000e+00 : f32
    %14 = vector.broadcast %cst_8 : f32 to vector<8x32xf32>
    %c0_9 = arith.constant 0 : index
    %c0_10 = arith.constant 0 : index
    %c0_11 = arith.constant 0 : index
    %c0_12 = arith.constant 0 : index
    %15 = vector.load %arg3[%c0_9, %c0_10, %c0_11, %c0_12] : memref<4x1x8x128xbf16, #tpu.memory_space<vmem>>, vector<1x1x8x128xbf16>
    %16 = vector.shape_cast %15 : vector<1x1x8x128xbf16> to vector<1x8x128xbf16>
    %c0_13 = arith.constant 0 : index
    %c0_14 = arith.constant 0 : index
    %c0_15 = arith.constant 0 : index
    %c0_16 = arith.constant 0 : index
    %17 = vector.load %arg4[%c0_13, %c0_14, %c0_15, %c0_16] : memref<4x1x8x128xbf16, #tpu.memory_space<vmem>>, vector<1x1x8x128xbf16>
    %18 = vector.shape_cast %17 : vector<1x1x8x128xbf16> to vector<1x8x128xbf16>
    %c0_17 = arith.constant 0 : index
    %c0_18 = arith.constant 0 : index
    %c0_19 = arith.constant 0 : index
    %19 = vector.load %arg7[%c0_17, %c0_18, %c0_19] : memref<4x32x8xbf16, #tpu.memory_space<vmem>>, vector<1x32x8xbf16>
    %20 = vector.shape_cast %19 : vector<1x32x8xbf16> to vector<32x8xbf16>
    %c0_20 = arith.constant 0 : index
    %c0_21 = arith.constant 0 : index
    %c0_22 = arith.constant 0 : index
    %21 = vector.load %arg8[%c0_20, %c0_21, %c0_22] : memref<4x8x32xbf16, #tpu.memory_space<vmem>>, vector<1x8x32xbf16>
    %22 = vector.shape_cast %21 : vector<1x8x32xbf16> to vector<8x32xbf16>
    %c0_23 = arith.constant 0 : index
    %c0_24 = arith.constant 0 : index
    %c0_25 = arith.constant 0 : index
    %c0_26 = arith.constant 0 : index
    %23 = vector.load %arg2[%c0_23, %c0_24, %c0_25, %c0_26] : memref<4x1x8x8xbf16, #tpu.memory_space<vmem>>, vector<1x1x8x8xbf16>
    %24 = vector.shape_cast %23 : vector<1x1x8x8xbf16> to vector<1x8x8xbf16>
    %25 = arith.extf %24 : vector<1x8x8xbf16> to vector<1x8x8xf32>
    %cst_27 = arith.constant dense<0.000000e+00> : vector<8x8xf32>
    %26 = tpu.matmul %13, %20, %cst_27 {dimension_numbers = #tpu.dot_dimension_numbers<[1], [0], [0], [1], [0, 0, 1, 1], [], []>} : vector<8x32xbf16>, vector<32x8xbf16>, vector<8x8xf32> -> vector<8x8xf32>
    %27 = vector.shape_cast %26 : vector<8x8xf32> to vector<1x8x8xf32>
    %28 = arith.addf %25, %27 : vector<1x8x8xf32>
    %29 = arith.truncf %28 : vector<1x8x8xf32> to vector<1x8x8xbf16>
    "tpu.trace_start"() <{level = 10 : i32, message = "bpd,bdn->bpn"}> : () -> ()
    %cst_28 = arith.constant dense<0.000000e+00> : vector<1x8x128xf32>
    %30 = tpu.matmul %29, %16, %cst_28 {dimension_numbers = #tpu.dot_dimension_numbers<[2], [1], [1], [2], [0, 0, 0, 1, 1, 2], [0], [0]>} : vector<1x8x8xbf16>, vector<1x8x128xbf16>, vector<1x8x128xf32> -> vector<1x8x128xf32>
    "tpu.trace_stop"() : () -> ()
    %cst_29 = arith.constant 0.353553385 : f32
    %31 = vector.broadcast %cst_29 : f32 to vector<1x8x128xf32>
    %32 = arith.mulf %30, %31 : vector<1x8x128xf32>
    %cst_30 = arith.constant -1.000000e+30 : f32
    %33 = vector.broadcast %cst_30 : f32 to vector<1x8x128xf32>
    %34 = arith.select %2, %33, %32 : vector<1x8x128xi1>, vector<1x8x128xf32>
    %cst_31 = arith.constant dense<0xFF800000> : vector<1x8xf32>
    %35 = vector.multi_reduction <maximumf>, %34, %cst_31 [2] : vector<1x8x128xf32> to vector<1x8xf32>
    %36 = vector.shape_cast %35 : vector<1x8xf32> to vector<1x8x1xf32>
    %37 = vector.broadcast %36 : vector<1x8x1xf32> to vector<1x8x128xf32>
    %38 = arith.subf %34, %37 : vector<1x8x128xf32>
    %39 = math.exp %38 : vector<1x8x128xf32>
    %cst_32 = arith.constant dense<0.000000e+00> : vector<1x8xf32>
    %40 = vector.multi_reduction <add>, %39, %cst_32 [2] : vector<1x8x128xf32> to vector<1x8xf32>
    %41 = vector.shape_cast %40 : vector<1x8xf32> to vector<1x8x1xf32>
    %42 = tpu.reciprocal %41 {approx = true} : vector<1x8x1xf32> -> vector<1x8x1xf32>
    %43 = vector.broadcast %42 : vector<1x8x1xf32> to vector<1x8x128xf32>
    %44 = arith.mulf %39, %43 : vector<1x8x128xf32>
    %45 = arith.truncf %44 : vector<1x8x128xf32> to vector<1x8x128xbf16>
    "tpu.trace_start"() <{level = 10 : i32, message = "bpn,bdn->bpd"}> : () -> ()
    %cst_33 = arith.constant dense<0.000000e+00> : vector<1x8x8xf32>
    %46 = tpu.matmul %45, %18, %cst_33 {dimension_numbers = #tpu.dot_dimension_numbers<[2], [2], [1], [1], [0, 0, 0, 1, 1, 1], [0], [0]>} : vector<1x8x128xbf16>, vector<1x8x128xbf16>, vector<1x8x8xf32> -> vector<1x8x8xf32>
    "tpu.trace_stop"() : () -> ()
    %47 = vector.shape_cast %46 : vector<1x8x8xf32> to vector<8x8xf32>
    %48 = arith.truncf %47 : vector<8x8xf32> to vector<8x8xbf16>
    %cst_34 = arith.constant dense<0.000000e+00> : vector<8x32xf32>
    %49 = tpu.matmul %48, %22, %cst_34 {dimension_numbers = #tpu.dot_dimension_numbers<[1], [0], [0], [1], [0, 0, 1, 1], [], []>} : vector<8x8xbf16>, vector<8x32xbf16>, vector<8x32xf32> -> vector<8x32xf32>
    %50 = arith.addf %14, %49 : vector<8x32xf32>
    %c1 = arith.constant 1 : index
    %c0_35 = arith.constant 0 : index
    %c0_36 = arith.constant 0 : index
    %c0_37 = arith.constant 0 : index
    %51 = vector.load %arg3[%c1, %c0_35, %c0_36, %c0_37] : memref<4x1x8x128xbf16, #tpu.memory_space<vmem>>, vector<1x1x8x128xbf16>
    %52 = vector.shape_cast %51 : vector<1x1x8x128xbf16> to vector<1x8x128xbf16>
    %c1_38 = arith.constant 1 : index
    %c0_39 = arith.constant 0 : index
    %c0_40 = arith.constant 0 : index
    %c0_41 = arith.constant 0 : index
    %53 = vector.load %arg4[%c1_38, %c0_39, %c0_40, %c0_41] : memref<4x1x8x128xbf16, #tpu.memory_space<vmem>>, vector<1x1x8x128xbf16>
    %54 = vector.shape_cast %53 : vector<1x1x8x128xbf16> to vector<1x8x128xbf16>
    %c1_42 = arith.constant 1 : index
    %c0_43 = arith.constant 0 : index
    %c0_44 = arith.constant 0 : index
    %55 = vector.load %arg7[%c1_42, %c0_43, %c0_44] : memref<4x32x8xbf16, #tpu.memory_space<vmem>>, vector<1x32x8xbf16>
    %56 = vector.shape_cast %55 : vector<1x32x8xbf16> to vector<32x8xbf16>
    %c1_45 = arith.constant 1 : index
    %c0_46 = arith.constant 0 : index
    %c0_47 = arith.constant 0 : index
    %57 = vector.load %arg8[%c1_45, %c0_46, %c0_47] : memref<4x8x32xbf16, #tpu.memory_space<vmem>>, vector<1x8x32xbf16>
    %58 = vector.shape_cast %57 : vector<1x8x32xbf16> to vector<8x32xbf16>
    %c1_48 = arith.constant 1 : index
    %c0_49 = arith.constant 0 : index
    %c0_50 = arith.constant 0 : index
    %c0_51 = arith.constant 0 : index
    %59 = vector.load %arg2[%c1_48, %c0_49, %c0_50, %c0_51] : memref<4x1x8x8xbf16, #tpu.memory_space<vmem>>, vector<1x1x8x8xbf16>
    %60 = vector.shape_cast %59 : vector<1x1x8x8xbf16> to vector<1x8x8xbf16>
    %61 = arith.extf %60 : vector<1x8x8xbf16> to vector<1x8x8xf32>
    %cst_52 = arith.constant dense<0.000000e+00> : vector<8x8xf32>
    %62 = tpu.matmul %13, %56, %cst_52 {dimension_numbers = #tpu.dot_dimension_numbers<[1], [0], [0], [1], [0, 0, 1, 1], [], []>} : vector<8x32xbf16>, vector<32x8xbf16>, vector<8x8xf32> -> vector<8x8xf32>
    %63 = vector.shape_cast %62 : vector<8x8xf32> to vector<1x8x8xf32>
    %64 = arith.addf %61, %63 : vector<1x8x8xf32>
    %65 = arith.truncf %64 : vector<1x8x8xf32> to vector<1x8x8xbf16>
    "tpu.trace_start"() <{level = 10 : i32, message = "bpd,bdn->bpn"}> : () -> ()
    %cst_53 = arith.constant dense<0.000000e+00> : vector<1x8x128xf32>
    %66 = tpu.matmul %65, %52, %cst_53 {dimension_numbers = #tpu.dot_dimension_numbers<[2], [1], [1], [2], [0, 0, 0, 1, 1, 2], [0], [0]>} : vector<1x8x8xbf16>, vector<1x8x128xbf16>, vector<1x8x128xf32> -> vector<1x8x128xf32>
    "tpu.trace_stop"() : () -> ()
    %cst_54 = arith.constant 0.353553385 : f32
    %67 = vector.broadcast %cst_54 : f32 to vector<1x8x128xf32>
    %68 = arith.mulf %66, %67 : vector<1x8x128xf32>
    %cst_55 = arith.constant -1.000000e+30 : f32
    %69 = vector.broadcast %cst_55 : f32 to vector<1x8x128xf32>
    %70 = arith.select %2, %69, %68 : vector<1x8x128xi1>, vector<1x8x128xf32>
    %cst_56 = arith.constant dense<0xFF800000> : vector<1x8xf32>
    %71 = vector.multi_reduction <maximumf>, %70, %cst_56 [2] : vector<1x8x128xf32> to vector<1x8xf32>
    %72 = vector.shape_cast %71 : vector<1x8xf32> to vector<1x8x1xf32>
    %73 = vector.broadcast %72 : vector<1x8x1xf32> to vector<1x8x128xf32>
    %74 = arith.subf %70, %73 : vector<1x8x128xf32>
    %75 = math.exp %74 : vector<1x8x128xf32>
    %cst_57 = arith.constant dense<0.000000e+00> : vector<1x8xf32>
    %76 = vector.multi_reduction <add>, %75, %cst_57 [2] : vector<1x8x128xf32> to vector<1x8xf32>
    %77 = vector.shape_cast %76 : vector<1x8xf32> to vector<1x8x1xf32>
    %78 = tpu.reciprocal %77 {approx = true} : vector<1x8x1xf32> -> vector<1x8x1xf32>
    %79 = vector.broadcast %78 : vector<1x8x1xf32> to vector<1x8x128xf32>
    %80 = arith.mulf %75, %79 : vector<1x8x128xf32>
    %81 = arith.truncf %80 : vector<1x8x128xf32> to vector<1x8x128xbf16>
    "tpu.trace_start"() <{level = 10 : i32, message = "bpn,bdn->bpd"}> : () -> ()
    %cst_58 = arith.constant dense<0.000000e+00> : vector<1x8x8xf32>
    %82 = tpu.matmul %81, %54, %cst_58 {dimension_numbers = #tpu.dot_dimension_numbers<[2], [2], [1], [1], [0, 0, 0, 1, 1, 1], [0], [0]>} : vector<1x8x128xbf16>, vector<1x8x128xbf16>, vector<1x8x8xf32> -> vector<1x8x8xf32>
    "tpu.trace_stop"() : () -> ()
    %83 = vector.shape_cast %82 : vector<1x8x8xf32> to vector<8x8xf32>
    %84 = arith.truncf %83 : vector<8x8xf32> to vector<8x8xbf16>
    %cst_59 = arith.constant dense<0.000000e+00> : vector<8x32xf32>
    %85 = tpu.matmul %84, %58, %cst_59 {dimension_numbers = #tpu.dot_dimension_numbers<[1], [0], [0], [1], [0, 0, 1, 1], [], []>} : vector<8x8xbf16>, vector<8x32xbf16>, vector<8x32xf32> -> vector<8x32xf32>
    %86 = arith.addf %50, %85 : vector<8x32xf32>
    %c2 = arith.constant 2 : index
    %c0_60 = arith.constant 0 : index
    %c0_61 = arith.constant 0 : index
    %c0_62 = arith.constant 0 : index
    %87 = vector.load %arg3[%c2, %c0_60, %c0_61, %c0_62] : memref<4x1x8x128xbf16, #tpu.memory_space<vmem>>, vector<1x1x8x128xbf16>
    %88 = vector.shape_cast %87 : vector<1x1x8x128xbf16> to vector<1x8x128xbf16>
    %c2_63 = arith.constant 2 : index
    %c0_64 = arith.constant 0 : index
    %c0_65 = arith.constant 0 : index
    %c0_66 = arith.constant 0 : index
    %89 = vector.load %arg4[%c2_63, %c0_64, %c0_65, %c0_66] : memref<4x1x8x128xbf16, #tpu.memory_space<vmem>>, vector<1x1x8x128xbf16>
    %90 = vector.shape_cast %89 : vector<1x1x8x128xbf16> to vector<1x8x128xbf16>
    %c2_67 = arith.constant 2 : index
    %c0_68 = arith.constant 0 : index
    %c0_69 = arith.constant 0 : index
    %91 = vector.load %arg7[%c2_67, %c0_68, %c0_69] : memref<4x32x8xbf16, #tpu.memory_space<vmem>>, vector<1x32x8xbf16>
    %92 = vector.shape_cast %91 : vector<1x32x8xbf16> to vector<32x8xbf16>
    %c2_70 = arith.constant 2 : index
    %c0_71 = arith.constant 0 : index
    %c0_72 = arith.constant 0 : index
    %93 = vector.load %arg8[%c2_70, %c0_71, %c0_72] : memref<4x8x32xbf16, #tpu.memory_space<vmem>>, vector<1x8x32xbf16>
    %94 = vector.shape_cast %93 : vector<1x8x32xbf16> to vector<8x32xbf16>
    %c2_73 = arith.constant 2 : index
    %c0_74 = arith.constant 0 : index
    %c0_75 = arith.constant 0 : index
    %c0_76 = arith.constant 0 : index
    %95 = vector.load %arg2[%c2_73, %c0_74, %c0_75, %c0_76] : memref<4x1x8x8xbf16, #tpu.memory_space<vmem>>, vector<1x1x8x8xbf16>
    %96 = vector.shape_cast %95 : vector<1x1x8x8xbf16> to vector<1x8x8xbf16>
    %97 = arith.extf %96 : vector<1x8x8xbf16> to vector<1x8x8xf32>
    %cst_77 = arith.constant dense<0.000000e+00> : vector<8x8xf32>
    %98 = tpu.matmul %13, %92, %cst_77 {dimension_numbers = #tpu.dot_dimension_numbers<[1], [0], [0], [1], [0, 0, 1, 1], [], []>} : vector<8x32xbf16>, vector<32x8xbf16>, vector<8x8xf32> -> vector<8x8xf32>
    %99 = vector.shape_cast %98 : vector<8x8xf32> to vector<1x8x8xf32>
    %100 = arith.addf %97, %99 : vector<1x8x8xf32>
    %101 = arith.truncf %100 : vector<1x8x8xf32> to vector<1x8x8xbf16>
    "tpu.trace_start"() <{level = 10 : i32, message = "bpd,bdn->bpn"}> : () -> ()
    %cst_78 = arith.constant dense<0.000000e+00> : vector<1x8x128xf32>
    %102 = tpu.matmul %101, %88, %cst_78 {dimension_numbers = #tpu.dot_dimension_numbers<[2], [1], [1], [2], [0, 0, 0, 1, 1, 2], [0], [0]>} : vector<1x8x8xbf16>, vector<1x8x128xbf16>, vector<1x8x128xf32> -> vector<1x8x128xf32>
    "tpu.trace_stop"() : () -> ()
    %cst_79 = arith.constant 0.353553385 : f32
    %103 = vector.broadcast %cst_79 : f32 to vector<1x8x128xf32>
    %104 = arith.mulf %102, %103 : vector<1x8x128xf32>
    %cst_80 = arith.constant -1.000000e+30 : f32
    %105 = vector.broadcast %cst_80 : f32 to vector<1x8x128xf32>
    %106 = arith.select %2, %105, %104 : vector<1x8x128xi1>, vector<1x8x128xf32>
    %cst_81 = arith.constant dense<0xFF800000> : vector<1x8xf32>
    %107 = vector.multi_reduction <maximumf>, %106, %cst_81 [2] : vector<1x8x128xf32> to vector<1x8xf32>
    %108 = vector.shape_cast %107 : vector<1x8xf32> to vector<1x8x1xf32>
    %109 = vector.broadcast %108 : vector<1x8x1xf32> to vector<1x8x128xf32>
    %110 = arith.subf %106, %109 : vector<1x8x128xf32>
    %111 = math.exp %110 : vector<1x8x128xf32>
    %cst_82 = arith.constant dense<0.000000e+00> : vector<1x8xf32>
    %112 = vector.multi_reduction <add>, %111, %cst_82 [2] : vector<1x8x128xf32> to vector<1x8xf32>
    %113 = vector.shape_cast %112 : vector<1x8xf32> to vector<1x8x1xf32>
    %114 = tpu.reciprocal %113 {approx = true} : vector<1x8x1xf32> -> vector<1x8x1xf32>
    %115 = vector.broadcast %114 : vector<1x8x1xf32> to vector<1x8x128xf32>
    %116 = arith.mulf %111, %115 : vector<1x8x128xf32>
    %117 = arith.truncf %116 : vector<1x8x128xf32> to vector<1x8x128xbf16>
    "tpu.trace_start"() <{level = 10 : i32, message = "bpn,bdn->bpd"}> : () -> ()
    %cst_83 = arith.constant dense<0.000000e+00> : vector<1x8x8xf32>
    %118 = tpu.matmul %117, %90, %cst_83 {dimension_numbers = #tpu.dot_dimension_numbers<[2], [2], [1], [1], [0, 0, 0, 1, 1, 1], [0], [0]>} : vector<1x8x128xbf16>, vector<1x8x128xbf16>, vector<1x8x8xf32> -> vector<1x8x8xf32>
    "tpu.trace_stop"() : () -> ()
    %119 = vector.shape_cast %118 : vector<1x8x8xf32> to vector<8x8xf32>
    %120 = arith.truncf %119 : vector<8x8xf32> to vector<8x8xbf16>
    %cst_84 = arith.constant dense<0.000000e+00> : vector<8x32xf32>
    %121 = tpu.matmul %120, %94, %cst_84 {dimension_numbers = #tpu.dot_dimension_numbers<[1], [0], [0], [1], [0, 0, 1, 1], [], []>} : vector<8x8xbf16>, vector<8x32xbf16>, vector<8x32xf32> -> vector<8x32xf32>
    %122 = arith.addf %86, %121 : vector<8x32xf32>
    %c3 = arith.constant 3 : index
    %c0_85 = arith.constant 0 : index
    %c0_86 = arith.constant 0 : index
    %c0_87 = arith.constant 0 : index
    %123 = vector.load %arg3[%c3, %c0_85, %c0_86, %c0_87] : memref<4x1x8x128xbf16, #tpu.memory_space<vmem>>, vector<1x1x8x128xbf16>
    %124 = vector.shape_cast %123 : vector<1x1x8x128xbf16> to vector<1x8x128xbf16>
    %c3_88 = arith.constant 3 : index
    %c0_89 = arith.constant 0 : index
    %c0_90 = arith.constant 0 : index
    %c0_91 = arith.constant 0 : index
    %125 = vector.load %arg4[%c3_88, %c0_89, %c0_90, %c0_91] : memref<4x1x8x128xbf16, #tpu.memory_space<vmem>>, vector<1x1x8x128xbf16>
    %126 = vector.shape_cast %125 : vector<1x1x8x128xbf16> to vector<1x8x128xbf16>
    %c3_92 = arith.constant 3 : index
    %c0_93 = arith.constant 0 : index
    %c0_94 = arith.constant 0 : index
    %127 = vector.load %arg7[%c3_92, %c0_93, %c0_94] : memref<4x32x8xbf16, #tpu.memory_space<vmem>>, vector<1x32x8xbf16>
    %128 = vector.shape_cast %127 : vector<1x32x8xbf16> to vector<32x8xbf16>
    %c3_95 = arith.constant 3 : index
    %c0_96 = arith.constant 0 : index
    %c0_97 = arith.constant 0 : index
    %129 = vector.load %arg8[%c3_95, %c0_96, %c0_97] : memref<4x8x32xbf16, #tpu.memory_space<vmem>>, vector<1x8x32xbf16>
    %130 = vector.shape_cast %129 : vector<1x8x32xbf16> to vector<8x32xbf16>
    %c3_98 = arith.constant 3 : index
    %c0_99 = arith.constant 0 : index
    %c0_100 = arith.constant 0 : index
    %c0_101 = arith.constant 0 : index
    %131 = vector.load %arg2[%c3_98, %c0_99, %c0_100, %c0_101] : memref<4x1x8x8xbf16, #tpu.memory_space<vmem>>, vector<1x1x8x8xbf16>
    %132 = vector.shape_cast %131 : vector<1x1x8x8xbf16> to vector<1x8x8xbf16>
    %133 = arith.extf %132 : vector<1x8x8xbf16> to vector<1x8x8xf32>
    %cst_102 = arith.constant dense<0.000000e+00> : vector<8x8xf32>
    %134 = tpu.matmul %13, %128, %cst_102 {dimension_numbers = #tpu.dot_dimension_numbers<[1], [0], [0], [1], [0, 0, 1, 1], [], []>} : vector<8x32xbf16>, vector<32x8xbf16>, vector<8x8xf32> -> vector<8x8xf32>
    %135 = vector.shape_cast %134 : vector<8x8xf32> to vector<1x8x8xf32>
    %136 = arith.addf %133, %135 : vector<1x8x8xf32>
    %137 = arith.truncf %136 : vector<1x8x8xf32> to vector<1x8x8xbf16>
    "tpu.trace_start"() <{level = 10 : i32, message = "bpd,bdn->bpn"}> : () -> ()
    %cst_103 = arith.constant dense<0.000000e+00> : vector<1x8x128xf32>
    %138 = tpu.matmul %137, %124, %cst_103 {dimension_numbers = #tpu.dot_dimension_numbers<[2], [1], [1], [2], [0, 0, 0, 1, 1, 2], [0], [0]>} : vector<1x8x8xbf16>, vector<1x8x128xbf16>, vector<1x8x128xf32> -> vector<1x8x128xf32>
    "tpu.trace_stop"() : () -> ()
    %cst_104 = arith.constant 0.353553385 : f32
    %139 = vector.broadcast %cst_104 : f32 to vector<1x8x128xf32>
    %140 = arith.mulf %138, %139 : vector<1x8x128xf32>
    %cst_105 = arith.constant -1.000000e+30 : f32
    %141 = vector.broadcast %cst_105 : f32 to vector<1x8x128xf32>
    %142 = arith.select %2, %141, %140 : vector<1x8x128xi1>, vector<1x8x128xf32>
    %cst_106 = arith.constant dense<0xFF800000> : vector<1x8xf32>
    %143 = vector.multi_reduction <maximumf>, %142, %cst_106 [2] : vector<1x8x128xf32> to vector<1x8xf32>
    %144 = vector.shape_cast %143 : vector<1x8xf32> to vector<1x8x1xf32>
    %145 = vector.broadcast %144 : vector<1x8x1xf32> to vector<1x8x128xf32>
    %146 = arith.subf %142, %145 : vector<1x8x128xf32>
    %147 = math.exp %146 : vector<1x8x128xf32>
    %cst_107 = arith.constant dense<0.000000e+00> : vector<1x8xf32>
    %148 = vector.multi_reduction <add>, %147, %cst_107 [2] : vector<1x8x128xf32> to vector<1x8xf32>
    %149 = vector.shape_cast %148 : vector<1x8xf32> to vector<1x8x1xf32>
    %150 = tpu.reciprocal %149 {approx = true} : vector<1x8x1xf32> -> vector<1x8x1xf32>
    %151 = vector.broadcast %150 : vector<1x8x1xf32> to vector<1x8x128xf32>
    %152 = arith.mulf %147, %151 : vector<1x8x128xf32>
    %153 = arith.truncf %152 : vector<1x8x128xf32> to vector<1x8x128xbf16>
    "tpu.trace_start"() <{level = 10 : i32, message = "bpn,bdn->bpd"}> : () -> ()
    %cst_108 = arith.constant dense<0.000000e+00> : vector<1x8x8xf32>
    %154 = tpu.matmul %153, %126, %cst_108 {dimension_numbers = #tpu.dot_dimension_numbers<[2], [2], [1], [1], [0, 0, 0, 1, 1, 1], [0], [0]>} : vector<1x8x128xbf16>, vector<1x8x128xbf16>, vector<1x8x8xf32> -> vector<1x8x8xf32>
    "tpu.trace_stop"() : () -> ()
    %155 = vector.shape_cast %154 : vector<1x8x8xf32> to vector<8x8xf32>
    %156 = arith.truncf %155 : vector<8x8xf32> to vector<8x8xbf16>
    %cst_109 = arith.constant dense<0.000000e+00> : vector<8x32xf32>
    %157 = tpu.matmul %156, %130, %cst_109 {dimension_numbers = #tpu.dot_dimension_numbers<[1], [0], [0], [1], [0, 0, 1, 1], [], []>} : vector<8x8xbf16>, vector<8x32xbf16>, vector<8x32xf32> -> vector<8x32xf32>
    %158 = arith.addf %122, %157 : vector<8x32xf32>
    %c0_110 = arith.constant 0 : index
    %c0_111 = arith.constant 0 : index
    %159 = vector.load %arg9[%c0_110, %c0_111] : memref<1x32xf32, #tpu.memory_space<vmem>>, vector<1x32xf32>
    %160 = vector.broadcast %159 : vector<1x32xf32> to vector<8x32xf32>
    %161 = arith.addf %158, %160 : vector<8x32xf32>
    %162 = vector.shape_cast %161 : vector<8x32xf32> to vector<1x8x32xf32>
    %163 = arith.truncf %162 : vector<1x8x32xf32> to vector<1x8x32xbf16>
    "tpu.trace_start"() <{level = 10 : i32, message = "bpe,ben->bpn"}> : () -> ()
    %cst_112 = arith.constant dense<0.000000e+00> : vector<1x8x128xf32>
    %164 = tpu.matmul %163, %5, %cst_112 {dimension_numbers = #tpu.dot_dimension_numbers<[2], [1], [1], [2], [0, 0, 0, 1, 1, 2], [0], [0]>} : vector<1x8x32xbf16>, vector<1x32x128xbf16>, vector<1x8x128xf32> -> vector<1x8x128xf32>
    "tpu.trace_stop"() : () -> ()
    %cst_113 = arith.constant 0.176776692 : f32
    %165 = vector.broadcast %cst_113 : f32 to vector<1x8x128xf32>
    %166 = arith.mulf %164, %165 : vector<1x8x128xf32>
    %167 = math.tanh %166 : vector<1x8x128xf32>
    %cst_114 = arith.constant 1.000000e+01 : f32
    %168 = vector.broadcast %cst_114 : f32 to vector<1x8x128xf32>
    %169 = arith.mulf %168, %167 : vector<1x8x128xf32>
    %cst_115 = arith.constant -1.000000e+30 : f32
    %170 = vector.broadcast %cst_115 : f32 to vector<1x8x128xf32>
    %171 = arith.select %2, %170, %169 : vector<1x8x128xi1>, vector<1x8x128xf32>
    %172 = arith.truncf %171 : vector<1x8x128xf32> to vector<1x8x128xbf16>
    %c0_116 = arith.constant 0 : index
    %c0_117 = arith.constant 0 : index
    %c0_118 = arith.constant 0 : index
    %173 = vector.load %arg10[%c0_116, %c0_117, %c0_118] : memref<1x8x128xbf16, #tpu.memory_space<vmem>>, vector<1x8x128xbf16>
    tpu.vector_store %arg10[%c0_116, %c0_117, %c0_118], %172 {strides = array<i32>} : memref<1x8x128xbf16, #tpu.memory_space<vmem>>, vector<1x8x128xbf16>,
    %cst_119 = arith.constant dense<0xFF800000> : vector<1x8xf32>
    %174 = vector.multi_reduction <maximumf>, %171, %cst_119 [2] : vector<1x8x128xf32> to vector<1x8xf32>
    %175 = vector.shape_cast %174 : vector<1x8xf32> to vector<1x8x1xf32>
    %176 = vector.broadcast %175 : vector<1x8x1xf32> to vector<1x8x128xf32>
    %177 = arith.cmpf oge, %171, %176 : vector<1x8x128xf32>
    %c128_i32 = arith.constant 128 : i32
    %178 = vector.broadcast %c128_i32 : i32 to vector<1x8x128xi32>
    %179 = arith.select %177, %4, %178 : vector<1x8x128xi1>, vector<1x8x128xi32>
    %cst_120 = arith.constant dense<2147483647> : vector<1x8xi32>
    %180 = vector.multi_reduction <minsi>, %179, %cst_120 [2] : vector<1x8x128xi32> to vector<1x8xi32>
    %181 = vector.shape_cast %180 : vector<1x8xi32> to vector<1x8x1xi32>
    %c0_121 = arith.constant 0 : index
    %c0_122 = arith.constant 0 : index
    %c0_123 = arith.constant 0 : index
    %182 = vector.load %arg11[%c0_121, %c0_122, %c0_123] : memref<1x8x1xi32, #tpu.memory_space<vmem>>, vector<1x8x1xi32>
    tpu.vector_store %arg11[%c0_121, %c0_122, %c0_123], %181 {strides = array<i32>} : memref<1x8x1xi32, #tpu.memory_space<vmem>>, vector<1x8x1xi32>,
    return
  }
  func.func @transform_0(%arg0: i32) -> (i32, i32, i32) {
    %c0_i32 = arith.constant 0 : i32
    %c0_i32_0 = arith.constant 0 : i32
    %c0_i32_1 = arith.constant 0 : i32
    return %arg0, %c0_i32, %c0_i32_0 : i32, i32, i32
  }
  func.func @transform_1(%arg0: i32) -> (i32, i32, i32, i32) {
    %c0_i32 = arith.constant 0 : i32
    %c0_i32_0 = arith.constant 0 : i32
    %c0_i32_1 = arith.constant 0 : i32
    %c0_i32_2 = arith.constant 0 : i32
    return %c0_i32, %arg0, %c0_i32_0, %c0_i32_1 : i32, i32, i32, i32
  }
  func.func @transform_2(%arg0: i32) -> (i32, i32, i32, i32) {
    %c0_i32 = arith.constant 0 : i32
    %c0_i32_0 = arith.constant 0 : i32
    %c0_i32_1 = arith.constant 0 : i32
    %c0_i32_2 = arith.constant 0 : i32
    return %c0_i32, %arg0, %c0_i32_0, %c0_i32_1 : i32, i32, i32, i32
  }
  func.func @transform_3(%arg0: i32) -> (i32, i32, i32, i32) {
    %c0_i32 = arith.constant 0 : i32
    %c0_i32_0 = arith.constant 0 : i32
    %c0_i32_1 = arith.constant 0 : i32
    %c0_i32_2 = arith.constant 0 : i32
    return %c0_i32, %arg0, %c0_i32_0, %c0_i32_1 : i32, i32, i32, i32
  }
  func.func @transform_4(%arg0: i32) -> (i32, i32, i32) {
    %c0_i32 = arith.constant 0 : i32
    %c0_i32_0 = arith.constant 0 : i32
    %c0_i32_1 = arith.constant 0 : i32
    return %arg0, %c0_i32, %c0_i32_0 : i32, i32, i32
  }
  func.func @transform_5(%arg0: i32) -> (i32, i32, i32) {
    %c0_i32 = arith.constant 0 : i32
    %c0_i32_0 = arith.constant 0 : i32
    %c0_i32_1 = arith.constant 0 : i32
    return %arg0, %c0_i32, %c0_i32_0 : i32, i32, i32
  }
  func.func @transform_6(%arg0: i32) -> (i32, i32, i32) {
    %c0_i32 = arith.constant 0 : i32
    %c0_i32_0 = arith.constant 0 : i32
    %c0_i32_1 = arith.constant 0 : i32
    %c0_i32_2 = arith.constant 0 : i32
    return %c0_i32, %c0_i32_0, %c0_i32_1 : i32, i32, i32
  }
  func.func @transform_7(%arg0: i32) -> (i32, i32, i32) {
    %c0_i32 = arith.constant 0 : i32
    %c0_i32_0 = arith.constant 0 : i32
    %c0_i32_1 = arith.constant 0 : i32
    %c0_i32_2 = arith.constant 0 : i32
    return %c0_i32, %c0_i32_0, %c0_i32_1 : i32, i32, i32
  }
  func.func @transform_8(%arg0: i32) -> (i32, i32) {
    %c0_i32 = arith.constant 0 : i32
    %c0_i32_0 = arith.constant 0 : i32
    %c0_i32_1 = arith.constant 0 : i32
    return %c0_i32, %c0_i32_0 : i32, i32
  }
  func.func @transform_9(%arg0: i32) -> (i32, i32, i32) {
    %c0_i32 = arith.constant 0 : i32
    %c0_i32_0 = arith.constant 0 : i32
    %c0_i32_1 = arith.constant 0 : i32
    return %arg0, %c0_i32, %c0_i32_0 : i32, i32, i32
  }
  func.func @transform_10(%arg0: i32) -> (i32, i32, i32) {
    %c0_i32 = arith.constant 0 : i32
    %c0_i32_0 = arith.constant 0 : i32
    %c0_i32_1 = arith.constant 0 : i32
    return %arg0, %c0_i32, %c0_i32_0 : i32, i32, i32
  }
}

</mosaic_0001>

<bundles_post_ra>
// kernel: tpu_custom_call.1
= control target key start
LH: loop header
LB: loop body
LE: loop exit
PB: predicated region body
PF: predicated region fallthrough
CT: control target
= control target key end

     0   :  { %s2754_s0 = inlined_call_operand.vmem [shape: s32[2,8,1], index: 0, kind: input, shape index: {}]   ;;  %s2755_s1 = inlined_call_operand.vmem [shape: bf16[4,2,8,8], index: 1, kind: input, shape index: {}]   ;;  %s2756_s2 = inlined_call_operand.vmem [shape: bf16[4,2,8,128], index: 2, kind: input, shape index: {}]   ;;  %s2757_s3 = inlined_call_operand.vmem [shape: bf16[4,2,8,128], index: 3, kind: input, shape index: {}]   ;;  %s2758_s4 = inlined_call_operand.hbm [shape: bf16[2,32,128], index: 4, kind: input, shape index: {}]   ;;  %s2759_s5 = inlined_call_operand.vmem [shape: s8[2,8,128], index: 5, kind: input, shape index: {}]   ;;  %s2760_s6 = inlined_call_operand.vmem [shape: bf16[4,32,8], index: 6, kind: input, shape index: {}]   ;;  %s2761_s7 = inlined_call_operand.hbm [shape: bf16[4,8,32], index: 7, kind: input, shape index: {}]   ;;  %s2762_s8 = inlined_call_operand.vmem [shape: f32[1,32], index: 8, kind: input, shape index: {}]   ;;  %s2763_s9 = inlined_call_operand.hbm [shape: bf16[2,8,128], index: 9, kind: output, shape index: {0}]   ;;  %s2764_s10 = inlined_call_operand.vmem [shape: s32[2,8,1], index: 10, kind: output, shape index: {1}]  }
   0x1   :  { %2772 = sst [smem:[#allocation17_spill]] %s2755_s1 }
   0x2   :  { %16 = vsyncpa [#allocation6], 0 }
   0x3   :  { %18 = vsyncpa [#allocation6 + $0x1], 0 }
   0x4   :  { %19 = vsyncpa [#allocation9], 0 }
   0x5   :  { %20 = vsyncpa [#allocation7], 0 }
   0x6   :  { %22 = vsyncpa [#allocation7 + $0x1], 0  ;;  %s2389_s13 = smov 0   ;;  %s2391_s14 = smov 0  }
   0x7   :  { %s2393_s15 = smov 0   ;;  %s2395_s16 = smov 0  }
   0x8 LB: > { %s2410_s17 = sadd.s32 4294967295, %s2321_s16   ;;  %s1874_s18 = sadd.s32 4294967294, %s2321_s16   ;;  %s2321_s16 = sphi %s2395_s16, %s2791_s16   ;;  %s2317_s15 = sphi %s2393_s15, %s2795_s15   ;;  %s2313_s14 = sphi %s2391_s14, %s2794_s14   ;;  %s2309_s13 = sphi %s2389_s13, %s2793_s13  }
   0x9   : > { %s2414_s19 = sadd.s32 1, %s2321_s16   ;;  %s61_s20 = sadd.s32 1, %s2317_s15 }
   0xa   : > { %2773 = sst [smem:[#allocation14_spill]] %s2414_s19  ;;  %s58_s21 = ssub.s32 %s2321_s16, %s2414_s19 }
   0xb   : > { %p68_p0 = scmp.ne.s32.totalorder %s2317_s15, %s2313_s14  ;;  %p59_p1 = scmp.eq.s32.totalorder %s58_s21, 0 }
   0xc   : > { %p69_p2 = scmp.eq.s32.totalorder %s2321_s16, 0  ;;  %p152_p3 = scmp.ne.s32.totalorder %s2313_s14, %s2309_s13 }
   0xd   : > { %p2771_p4 = scmp.eq.s32.totalorder %s2410_s17, 0  ;;  %p265_p7 = scmp.eq.s32.totalorder %s2410_s17, 1 }
   0xe   : > { %s2426_s22 = scalar_select %p59_p1, %s2317_s15, %s61_s20  }
   0xf   : > { %p2428_p5 = por %p69_p2, %p68_p0  ;;  %p2434_p6 = por %p2771_p4, %p152_p3 }
  0x10   : > { %2774 = sst [smem:[#allocation15_spill]] %s2426_s22  ;;  %p271_p8 = scmp.eq.s32.totalorder %s1874_s18, 1 }
  0x11   : > { %s2776_s24 = scalar_select %p2434_p6, 1, 0 }
  0x12   : > { %p1875_p9 = scmp.ge.s32.totalorder %s2321_s16, 1  ;;  %p304_p10 = scmp.lt.s32.totalorder %s2321_s16, 3 }
  0x13   : > { %p2441_p11 = por %p265_p7, %p68_p0  ;;  %p2445_p12 = por %p271_p8, %p152_p3 }
  0x14   : > { %p2449_p13 = pnand %p1875_p9, %p304_p10  ;;  %s2323_s28 = smov [#allocation8]  }
  0x15   : > { %s2777_s25 = scalar_select %p2441_p11, 1, 0 }
  0x16   : > { %s2778_s26 = scalar_select %p2445_p12, 1, 0 }
  0x17   : > { %p2120_p1 = pneg %p2449_p13  ;;  %s319_s29 = sshll.u32 %s2323_s28, 4  ;;  %s320_s29 = int_to_ptr.vmem [resolvable:$true] %s319_s29 }
  0x18   : > { %2779 = sst [smem:[#allocation16_spill]] %s2778_s26  ;;  %s2212_s30 = scalar_lea.vmem %s320_s29, 256 }
  0x19   : > { %p2121_p2 = pnand %p2120_p1, %p2771_p4  ;;  %p2213_p7 = scmp.ne.s32.totalorder %s320_s29, %s2212_s30 }
  0x1a   : > { %p2220_p8 = scmp.lt.s32.totalorder %s320_s29, %s320_s29  ;;  %p2221_p6 = scmp.lt.s32.totalorder %s2212_s30, %s2212_s30 }
  0x1b   : > { %p2203_p0 = pneg %p2121_p2 }
  0x1c   : > { %p2222_p12 = por %p2221_p6, %p2220_p8 }
  0x1d   : > { %p2215_p11 = pnand %p2213_p7, %p2203_p0 }
  0x1f   : > { %p2216_p3 = pneg %p2215_p11 }
  0x21   : > { %p2223_p9 = pnand %p2222_p12, %p2216_p3 }
  0x23   : > { %2226 = shalt.err (!%p2223_p9)
}
  0x24   : > { %s2324_s11 = smov 64   ;;  %s2325_s12 = smov 4  }
  0x25   : > { %2123 = dma.hbm_to_vmem [thread:$0]  (!%p2121_p2), %s2761_s7, 256, %s320_s29, [#allocation9], %s2324_s11, %s2324_s11, %s2325_s12  }
  0x26   : > { %p2770_p10 = scmp.ge.s32.totalorder %s2321_s16, 2 }
  0x28   : > { %332 = sbr.rel (%p2770_p10) target bundleno = 94 (0x5e), region = 28 }
  0x2d   : > { %342 = sbr.rel (!%p2428_p5) target bundleno = 57 (0x39), region = 36  ;;  %s344_s21 = sand.u32 (%p2428_p5), 1, %s2317_s15  }
  0x2e   : > { %s1879_s28 = sshll.u32 (%p2428_p5), %s2321_s16, 2  ;;  %s1878_s30 = sshll.u32 (%p2428_p5), %s344_s21, 4 }
  0x2f   : > { %s2781_s1 = sld [smem:[#allocation17_spill]] (%p2428_p5)  ;;  %s346_s29 = scalar_lea.vmem (%p2428_p5), [#allocation2], %s1878_s30 }
  0x35   : > { %s348_s26 = scalar_lea.vmem %s2781_s1, %s1879_s28 }
  0x36   : > { %v365_v0 = vld [vmem:[%s348_s26] sm:$0xf]  ;;  %v367_v1 = vld [vmem:[%s348_s26 + $0x8] sm:$0xf]  ;;  %v369_v2 = vld [vmem:[%s348_s26 + $0x10] sm:$0xf] }
  0x37   : > { %366 = vst [vmem:[%s346_s29] sm:$0xf] %v365_v0  ;;  %368 = vst [vmem:[%s346_s29 + $0x4] sm:$0xf] %v367_v1  ;;  %v371_v3 = vld [vmem:[%s348_s26 + $0x18] sm:$0xf] }
  0x38   : > { %370 = vst [vmem:[%s346_s29 + $0x8] sm:$0xf] %v369_v2  ;;  %372 = vst [vmem:[%s346_s29 + $0xc] sm:$0xf] %v371_v3 }
  0x39 PF: > { %404 = sbr.rel (!%p2428_p5) target bundleno = 63 (0x3f), region = 77  ;;  %s406_s11 = sand.u32 (%p2428_p5), 1, %s2317_s15  }
  0x3a   : > { %s1881_s12 = sshll.u32 (%p2428_p5), %s2321_s16, 2  ;;  %s1880_s18 = sshll.u32 (%p2428_p5), %s406_s11, 4 }
  0x3b   : > { %s410_s20 = scalar_lea.vmem (%p2428_p5), %s2756_s2, %s1881_s12  ;;  %s408_s21 = scalar_lea.vmem (%p2428_p5), [#allocation3], %s1880_s18 }
  0x3c   : > { %v427_v4 = vld [vmem:[%s410_s20] sm:$0xf] (%p2428_p5)  ;;  %v429_v5 = vld [vmem:[%s410_s20 + $0x8] sm:$0xf] (%p2428_p5)  ;;  %v431_v6 = vld [vmem:[%s410_s20 + $0x10] sm:$0xf] (%p2428_p5) }
  0x3d   : > { %428 = vst [vmem:[%s408_s21] sm:$0xf] (%p2428_p5), %v427_v4  ;;  %430 = vst [vmem:[%s408_s21 + $0x4] sm:$0xf] (%p2428_p5), %v429_v5  ;;  %v433_v7 = vld [vmem:[%s410_s20 + $0x18] sm:$0xf] (%p2428_p5) }
  0x3e   : > { %432 = vst [vmem:[%s408_s21 + $0x8] sm:$0xf] %v431_v6  ;;  %434 = vst [vmem:[%s408_s21 + $0xc] sm:$0xf] %v433_v7 }
  0x3f PF: > { %466 = sbr.rel (!%p2428_p5) target bundleno = 69 (0x45), region = 118  ;;  %s468_s26 = sand.u32 (%p2428_p5), 1, %s2317_s15  }
  0x40   : > { %s1883_s28 = sshll.u32 (%p2428_p5), %s2321_s16, 2  ;;  %s1882_s30 = sshll.u32 (%p2428_p5), %s468_s26, 4 }
  0x41   : > { %s472_s12 = scalar_lea.vmem (%p2428_p5), %s2757_s3, %s1883_s28  ;;  %s470_s18 = scalar_lea.vmem (%p2428_p5), [#allocation4], %s1882_s30 }
  0x42   : > { %v489_v8 = vld [vmem:[%s472_s12] sm:$0xf] (%p2428_p5)  ;;  %v491_v9 = vld [vmem:[%s472_s12 + $0x8] sm:$0xf] (%p2428_p5)  ;;  %v493_v10 = vld [vmem:[%s472_s12 + $0x10] sm:$0xf] (%p2428_p5) }
  0x43   : > { %490 = vst [vmem:[%s470_s18] sm:$0xf] (%p2428_p5), %v489_v8  ;;  %492 = vst [vmem:[%s470_s18 + $0x4] sm:$0xf] (%p2428_p5), %v491_v9  ;;  %v495_v11 = vld [vmem:[%s472_s12 + $0x18] sm:$0xf] (%p2428_p5) }
  0x44   : > { %494 = vst [vmem:[%s470_s18 + $0x8] sm:$0xf] %v493_v10  ;;  %496 = vst [vmem:[%s470_s18 + $0xc] sm:$0xf] %v495_v11 }
  0x45 PF: > { %s529_s19 = sand.u32 1, %s2317_s15   ;;  %s1949_s22 = sshll.u32 %s2321_s16, 8 }
  0x46   : > { %s1884_s20 = sshll.u32 %s529_s19, 4  ;;  %s2489_s28 = scalar_lea.hbm %s2758_s4, %s1949_s22 }
  0x47   : > { %s533_s30 = scalar_lea.vmem [#allocation5], %s1884_s20  ;;  %s2493_s11 = scalar_lea.sflag [#allocation6], %s529_s19 }
  0x48   : > { %s540_s29 = sshll.u32 %s533_s30, 4  ;;  %s2227_s12 = scalar_lea.hbm %s2489_s28, 256  ;;  %s2491_s29 = int_to_ptr.vmem [resolvable:$true] %s540_s29 }
  0x49   : > { %p2228_p6 = scmp.ne.s32.totalorder %s2489_s28, %s2227_s12  ;;  %s2231_s21 = scalar_lea.hbm %s2758_s4, 512 }
  0x4a   : > { %p2232_p1 = scmp.lt.s32.totalorder %s2489_s28, %s2758_s4  ;;  %p2233_p2 = scmp.lt.s32.totalorder %s2231_s21, %s2227_s12 }
  0x4b   : > { %p2229_p11 = pnand %p2228_p6, %p2428_p5 }
  0x4c   : > { %p2234_p0 = por %p2233_p2, %p2232_p1 }
  0x4d   : > { %p2230_p12 = pneg %p2229_p11 }
  0x4f   : > { %p2235_p7 = pnand %p2234_p0, %p2230_p12 }
  0x51   : > { %2238 = shalt.err (!%p2235_p7)
}
  0x52   : > { %s2239_s19 = scalar_lea.vmem %s2491_s29, 256  ;;  %s2326_s20 = smov [#allocation5]  }
  0x53   : > { %p2240_p3 = scmp.ne.s32.totalorder %s2491_s29, %s2239_s19  ;;  %s2243_s1 = sshll.u32 %s2326_s20, 4  ;;  %s2244_s1 = int_to_ptr.vmem [resolvable:$false] %s2243_s1 }
  0x54   : > { %s2245_s30 = scalar_lea.vmem %s2244_s1, 512  ;;  %p2246_p6 = scmp.lt.s32.totalorder %s2491_s29, %s2244_s1 }
  0x55   : > { %p2241_p8 = pnand %p2240_p3, %p2428_p5  ;;  %p2247_p11 = scmp.lt.s32.totalorder %s2245_s30, %s2239_s19 }
  0x57   : > { %p2242_p9 = pneg %p2241_p8  ;;  %p2248_p10 = por %p2247_p11, %p2246_p6 }
  0x59   : > { %p2249_p4 = pnand %p2248_p10, %p2242_p9 }
  0x5b   : > { %2252 = shalt.err (!%p2249_p4)
}
  0x5c   : > { %s2327_s12 = smov 64   ;;  %s2328_s18 = smov 4  }
  0x5d   : > { %2114 = dma.hbm_to_vmem [thread:$0]  (%p2428_p5), %s2489_s28, 256, %s2491_s29, %s2493_s11, %s2327_s12, %s2327_s12, %s2328_s18  }
  0x5e PF: > { %559 = sbr.rel (%p2449_p13) target bundleno = 4308 (0x10d4), region = 167  ;;  %s2519_s21 = sand.u32 (!%p2449_p13), 1, %s2313_s14  }
  0x5f   : > { %s2522_s22 = sshll.u32 (!%p2449_p13), %s2519_s21, 4  ;;  %s583_s28 = scalar_lea.sflag (!%p2449_p13), [#allocation6], %s2519_s21 }
  0x60   : > { %s564_s26 = scalar_lea.vmem (!%p2449_p13), [#allocation2], %s2522_s22  ;;  %s2526_s19 = scalar_lea.vmem (!%p2449_p13), [#allocation3], %s2522_s22 }
  0x61   : > { %s2529_s23 = scalar_lea.vmem (!%p2449_p13), [#allocation4], %s2522_s22  ;;  %s586_s27 = scalar_lea.vmem (!%p2449_p13), [#allocation5], %s2522_s22 }
  0x62   : > { %p2782_p4 = scmp.ne.s32.totalorder (!%p2449_p13), %s2776_s24, 0 }
  0x64   : > { %2296 = dma.done.wait (%p2782_p4), %s583_s28, 256  }
  0x65   : > { %2298 = vsyncadd (%p2782_p4), %s583_s28, 4294967040  ;;  %p2783_p5 = scmp.eq.s32.totalorder %s2410_s17, 0 }
  0x67   : > { %2300 = dma.done.wait (%p2783_p5), [#allocation9], 256   ;;  %p2784_p13 = pmov %p2783_p5 }
  0x68   : > { %p651_p10 = scmp.lt.s32.totalorder %s2410_s17, 1  ;;  %v2329_v12 = vmov 0   ;;  %v2330_v13 = vmov 0.0   ;;  %vm2331_vm0 = vmmov 0   ;;  %v2561_v16 = vld [vmem:[%s586_s27 + $0x8] sm:$0xff]   ;;  %v2568_v19 = vld [vmem:[%s586_s27] sm:$0xff]   ;;  %v669_v20 = vlaneseq }
  0x69   : > { %2302 = vsyncadd (%p2784_p13), [#allocation9], 4294967040  ;;  %2172 = vset.pattern.permute.xlu0 %v2329_v12  ;;  %1992 = vmatprep.subr.bf16.mxu0 %v2330_v13  ;;  %v2175_v18 = vld [vmem:[%s2760_s6 + $0x8] sm:$0xff]   ;;  %v2332_v23 = vmov 1.0|1.0   ;;  %v2176_v24 = vld [vmem:[%s2760_s6] sm:$0xff]  }
  0x6a   : > { %s2544_s29 = scalar_select %p651_p10, %s2410_s17, 1  ;;  %2000 = vmatprep.subr.bf16.mxu1 %v2330_v13  ;;  %1996 = vmatprep.mubr.msk.bf16.mxu0 %vm2331_vm0, %v2330_v13  ;;  %v2573_v21 = vand.u32 127, %v669_v20  ;;  %v735_v25 = vld [vmem:[%s2526_s19] sm:$0xf]  ;;  %vm806_vm4 = vcmask 1043456   ;;  %vm756_vm5 = vcmask 261120  }
  0x6b   : > { %2004 = vmatprep.mubr.msk.bf16.mxu1 %vm2331_vm0, %v2330_v13  ;;  %1993 = vmatpush3.bf16.xpose.msra.mxu0 %v2561_v16  ;;  %v808_v28 = vsel %vm806_vm4, %v735_v25, 0  ;;  %v742_v32 = vld [vmem:[%s564_s26] sm:$0xff]   ;;  %vm802_vm6 = vcmask 64512   ;;  %v2177_v37 = vld [vmem:[%s2760_s6 + $0x18] sm:$0xff]   ;;  %s1893_s18 = sshll.u32 %s2519_s21, 2  ;;  %p2787_p1 = scmp.ne.s32.totalorder %s2777_s25, 0 }
  0x6c   : > { %s1895_s24 = sshll.u32 %s2544_s29, 1  ;;  %s1894_s11 = sshll.u32 %s2544_s29, 3  ;;  %1994 = vmatprep.subr.bf16.mxu0 %v2330_v13  ;;  %2001 = vmatpush3.bf16.msra.mxu1 %v2175_v18  ;;  %v743_v33 = vunpack.c.l.bf16 %v742_v32  ;;  %v2178_v41 = vld [vmem:[%s2760_s6 + $0x10] sm:$0xff]   ;;  %v919_v63 = vunpack.c.h.bf16 %v742_v32 }
  0x6d   : > { %s658_s30 = scalar_lea.vmem %s2759_s5, %s1895_s24  ;;  %s654_s28 = scalar_lea.vmem %s2754_s0, %s1894_s11  ;;  %2002 = vmatprep.subr.bf16.mxu1 %v2330_v13  ;;  %v736_v58 = vld [vmem:[%s2529_s23] sm:$0xf]  ;;  %v1906_v61 = vld [vmem:[%s2526_s19 + $0x4] sm:$0xf] }
  0x6e   : > { %v666_v14 = vld [vmem:[%s658_s30] sm:$0x3]  ;;  %v978_v1 = vsel %vm806_vm4, %v1906_v61, 0  ;;  %s1946_s24 = sshll.u32 %s2410_s17, 6  ;;  %s2333_s12 = smov [#allocation10]  }
  0x6f   : > { %v668_v15 = vld [vmem:[%s654_s28] sm:$0xff]  ;;  %vm667_vm1 = vnez %v666_v14  ;;  %s644_s28 = scalar_lea.vmem [#allocation10], %s1893_s18  ;;  %s1687_s22 = scalar_lea.hbm %s2763_s9, %s1946_s24 }
  0x70   : > { %676 = vperm.xlu0 %2172, %v668_v15   ;;  %v851_v17 = vsel %vm667_vm1, 16843009, %v2329_v12  ;;  %2003 = vmatpush3.bf16.msra.mxu1 %v2176_v24  ;;  %s1689_s20 = sshll.u32 %s644_s28, 4  ;;  %s1690_s20 = int_to_ptr.vmem [resolvable:$true] %s1689_s20 }
  0x71   : > { %2008 = vmatprep.subr.bf16.mxu1 %v2330_v13  ;;  %v852_v42 = vunpack.c.0.s8 %v851_v17  ;;  %s2253_s30 = scalar_lea.vmem %s1690_s20, 64 }
  0x72   : > { %p2254_p12 = scmp.ne.s32.totalorder %s1690_s20, %s2253_s30 }
  0x73   : > { %1995 = vmatpush3.bf16.xpose.msra.mxu0 %v2568_v19  ;;  %vm2608_vm7 = vcmp.ne.s32.totalorder %v852_v42, 0 }
  0x74   : > { %2014 = vmatprep.subr.bf16.mxu0 %v2330_v13  ;;  %p2255_p2 = pnand %p2254_p12, %p2787_p1 }
  0x76   : > { %p2256_p0 = pneg %p2255_p2 }
  0xeb   : > { %v677_v22 = vpop.permute.xlu0 %676 }
  0xec   : > { %vm678_vm2 = vcmp.eq.s32.totalorder %v2573_v21, %v677_v22  ;;  %v1907_v22 = vld [vmem:[%s2529_s23 + $0x4] sm:$0xf] }
  0xed   : > { %vm1900_vm3 = vmpackc.low %vm678_vm2, %vm678_vm2 }
  0xee   : > { %1997 = vmatmul.mubr.msk.bf16.vlgmr.msra.gmra.mxu0 %vm1900_vm3, %v2332_v23  ;;  %v916_v23 = vld [vmem:[#allocation8 + $0x4] sm:$0xf] }
  0xef   : > { %2016 = vmatprep.mubr.msk.bf16.mxu0 %vm2331_vm0, %v2330_v13  ;;  %2015 = vmatpush3.bf16.xpose.msra.mxu0 %v736_v58  ;;  %v1077_v24 = vsel %vm806_vm4, %v916_v23, 0 }
  0xf0   : > { %2028 = vmatprep.subr.bf16.mxu0 %v2330_v13 }
 0x1ae   : > { %v728_v26 = vpop.f32.mrf.mxu0 }
 0x1af   : > { %v2583_v27 = vpack.c.bf16 %v728_v26, %v728_v26 }
 0x1b0   : > { %v1998_v29 = vpop.f32.mrf.mxu0 }
 0x1b1   : > { %2005 = vmatmul.mubr.msk.bf16.vlgmr.msra.gmra.mxu1 %vm756_vm5, %v2583_v27 }
 0x1b2   : > { %v731_v30 = vpop.f32.mrf.mxu0  ;;  %2009 = vmatpush3.bf16.msra.mxu1 %v808_v28  ;;  %2010 = vmatprep.mubr.msk.bf16.mxu1 %vm2331_vm0, %v2330_v13  ;;  %v741_v28 = vld [vmem:[#allocation8] sm:$0xf] }
 0x1b3   : > { %2020 = vmatprep.subr.bf16.mxu1 %v2330_v13 }
 0x1b4   : > { %v1999_v31 = vpop.f32.mrf.mxu0 }
 0x1b5   : > { %v1123_v31 = vsel %vm806_vm4, %v741_v28, 0 }
 0x271   : > { %v794_v34 = vpop.f32.mrf.mxu1 }
 0x272   : > { %v800_v35 = vadd.f32 %v794_v34, %v743_v33  ;;  %v2179_v34 = vld [vmem:[%s2760_s6 + $0x28] sm:$0xff]  }
 0x273   : > { %v2006_v36 = vpop.f32.mrf.mxu1 }
 0x274   : > { %v801_v38 = vpack.c.bf16 %v800_v35, %v800_v35 }
 0x275   : > { %v797_v39 = vpop.f32.mrf.mxu1 }
 0x276   : > { %2011 = vmatmul.mubr.msk.bf16.vlgmr.msra.gmra.mxu1 %vm802_vm6, %v801_v38  ;;  %v2180_v38 = vld [vmem:[%s2760_s6 + $0x20] sm:$0xff]  }
 0x277   : > { %v2007_v40 = vpop.f32.mrf.mxu1  ;;  %2021 = vmatpush3.bf16.msra.mxu1 %v2177_v37  ;;  %2024 = vmatprep.mubr.msk.bf16.mxu1 %vm2331_vm0, %v2330_v13 }
 0x278   : > { %2022 = vmatprep.subr.bf16.mxu1 %v2330_v13 }
 0x27b   : > { %2023 = vmatpush3.bf16.msra.mxu1 %v2178_v41 }
 0x27c   : > { %2034 = vmatprep.subr.bf16.mxu1 %v2330_v13 }
 0x27e   : > { %2025 = vmatmul.mubr.msk.bf16.vlgmr.msra.gmra.mxu1 %vm756_vm5, %v2583_v27 }
 0x27f   : > { %2036 = vmatprep.mubr.msk.bf16.mxu1 %vm2331_vm0, %v2330_v13  ;;  %2035 = vmatpush3.bf16.xpose.msra.mxu1 %v1907_v22 }
 0x280   : > { %2046 = vmatprep.subr.bf16.mxu1 %v2330_v13 }
 0x336   : > { %v844_v44 = vpop.f32.mrf.mxu1 }
 0x337   : > { %v850_v45 = vmul.f32 0.35355338, %v844_v44 }
 0x338   : > { %v2012_v46 = vpop.f32.mrf.mxu1 }
 0x339   : > { %v854_v47 = vsel %vm2608_vm7, -1e+30, %v850_v45  ;;  %v1919_v45 = vld [vmem:[%s2526_s19 + $0x8] sm:$0xf] }
 0x33a   : > { %v847_v48 = vpop.f32.mrf.mxu1  ;;  %855 = vmax.xlane.f32.xlu0 %v854_v47  ;;  %v1237_v46 = vsel %vm806_vm4, %v1919_v45, 0 }
 0x33c   : > { %v2013_v49 = vpop.f32.mrf.mxu1 }
 0x33d   : > { %v1925_v49 = vld [vmem:[%s564_s26 + $0x8] sm:$0xff]   ;;  %s1672_s26 = scalar_lea.sflag [#allocation7], %s2519_s21 }
 0x33e   : > { %v966_v50 = vpop.f32.mrf.mxu1 }
 0x33f   : > { %v972_v2 = vadd.f32 %v966_v50, %v919_v63 }
 0x340   : > { %v2026_v51 = vpop.f32.mrf.mxu1 }
 0x341   : > { %v973_v3 = vpack.c.bf16 %v972_v2, %v972_v2  ;;  %v1178_v51 = vunpack.c.l.bf16 %v1925_v49 }
 0x342   : > { %v969_v52 = vpop.f32.mrf.mxu1 }
 0x344   : > { %v2027_v53 = vpop.f32.mrf.mxu1 }
 0x3c3   : > { %v856_v54 = vpop.xlane.xlu0 %855 }
 0x3c4   : > { %v857_v55 = vsub.f32 %v854_v47, %v856_v54 }
 0x3c6   : > { %v858_v56 = vmul.f32 1.442695, %v857_v55 }
 0x3c8   : > { %2183 = vpow2.f32 %v858_v56 }
 0x3d5   : > { %v2184_v57 = vpop.eup %2183 }
 0x3d6   : > { %860 = vadd.xlane.f32.xlu1 %v2184_v57 }
 0x45f   : > { %v861_v59 = vpop.xlane.xlu1 %860 }
 0x460   : > { %2185 = vrcp.f32 %v861_v59 }
 0x46d   : > { %v2186_v60 = vpop.eup %2185 }
 0x46e   : > { %v863_v62 = vmul.f32 %v2186_v60, %v2184_v57 }
 0x470   : > { %v864_v0 = vpack.c.bf16 %v863_v62, %v863_v62 }
 0x472   : > { %2017 = vmatmul.mubr.bf16.vlgmr.msra.gmra.mxu0 %v864_v0 }
 0x473   : > { %2029 = vmatpush3.bf16.msra.mxu0 %v978_v1  ;;  %2030 = vmatprep.mubr.msk.bf16.mxu0 %vm2331_vm0, %v2330_v13 }
 0x474   : > { %2040 = vmatprep.subr.bf16.mxu0 %v2330_v13 }
 0x47a   : > { %2031 = vmatmul.mubr.msk.bf16.vlgmr.msra.gmra.mxu0 %vm802_vm6, %v973_v3 }
 0x47b   : > { %2042 = vmatprep.mubr.msk.bf16.mxu0 %vm2331_vm0, %v2330_v13  ;;  %2041 = vmatpush3.bf16.msra.mxu0 %v1077_v24  ;;  %v1392_v24 = vunpack.c.h.bf16 %v1925_v49 }
 0x47c   : > { %2052 = vmatprep.subr.bf16.mxu0 %v2330_v13 }
 0x532   : > { %v899_v4 = vpop.f32.mrf.mxu0 }
 0x533   : > { %v905_v32 = vpack.c.bf16 %v899_v4, %v899_v4 }
 0x534   : > { %v2018_v5 = vpop.f32.mrf.mxu0 }
 0x535   : > { %v1920_v5 = vld [vmem:[%s2529_s23 + $0x8] sm:$0xf] }
 0x536   : > { %v902_v6 = vpop.f32.mrf.mxu0 }
 0x537   : > { %v1175_v6 = vld [vmem:[#allocation8 + $0x8] sm:$0xf] }
 0x538   : > { %v2019_v7 = vpop.f32.mrf.mxu0 }
 0x539   : > { %v1336_v7 = vsel %vm806_vm4, %v1175_v6, 0 }
 0x53a   : > { %v1014_v8 = vpop.f32.mrf.mxu0 }
 0x53b   : > { %v1020_v9 = vmul.f32 0.35355338, %v1014_v8 }
 0x53c   : > { %v2032_v10 = vpop.f32.mrf.mxu0 }
 0x53d   : > { %v1021_v11 = vsel %vm2608_vm7, -1e+30, %v1020_v9 }
 0x53e   : > { %1022 = vmax.xlane.f32.xlu1 %v1021_v11  ;;  %v1017_v12 = vpop.f32.mrf.mxu0 }
 0x540   : > { %v2033_v14 = vpop.f32.mrf.mxu0 }
 0x541   : > { %v2182_v14 = vld [vmem:[%s2760_s6 + $0x30] sm:$0xff]  }
 0x5c7   : > { %v1023_v15 = vpop.xlane.xlu1 %1022 }
 0x5c8   : > { %v1024_v17 = vsub.f32 %v1021_v11, %v1023_v15  ;;  %v2181_v11 = vld [vmem:[%s2760_s6 + $0x38] sm:$0xff]  }
 0x5c9   : > { %v1931_v15 = vld [vmem:[%s2526_s19 + $0xc] sm:$0xf]  ;;  %s2257_s19 = sshll.u32 %s2333_s12, 4  ;;  %s2258_s19 = int_to_ptr.vmem [resolvable:$false] %s2257_s19 }
 0x5ca   : > { %v1025_v18 = vmul.f32 1.442695, %v1024_v17  ;;  %p2260_p7 = scmp.lt.s32.totalorder %s1690_s20, %s2258_s19 }
 0x5cc   : > { %2187 = vpow2.f32 %v1025_v18 }
 0x5d9   : > { %v2188_v20 = vpop.eup %2187 }
 0x5da   : > { %1027 = vadd.xlane.f32.xlu1 %v2188_v20 }
 0x663   : > { %v1028_v25 = vpop.xlane.xlu1 %1027 }
 0x664   : > { %2189 = vrcp.f32 %v1028_v25 }
 0x671   : > { %v2190_v26 = vpop.eup %2189 }
 0x672   : > { %v1030_v29 = vmul.f32 %v2190_v26, %v2188_v20  ;;  %v1451_v20 = vsel %vm806_vm4, %v1931_v15, 0 }
 0x674   : > { %v1031_v30 = vpack.c.bf16 %v1030_v29, %v1030_v29 }
 0x676   : > { %2037 = vmatmul.mubr.bf16.vlgmr.msra.gmra.mxu1 %v1031_v30 }
 0x677   : > { %2047 = vmatpush3.bf16.msra.mxu1 %v1123_v31  ;;  %2048 = vmatprep.mubr.msk.bf16.mxu1 %vm2331_vm0, %v2330_v13 }
 0x678   : > { %2060 = vmatprep.subr.bf16.mxu1 %v2330_v13 }
 0x67e   : > { %2049 = vmatmul.mubr.msk.bf16.vlgmr.msra.gmra.mxu1 %vm802_vm6, %v905_v32 }
 0x67f   : > { %2062 = vmatprep.mubr.msk.bf16.mxu1 %vm2331_vm0, %v2330_v13  ;;  %2061 = vmatpush3.bf16.msra.mxu1 %v1237_v46 }
 0x680   : > { %2072 = vmatprep.subr.bf16.mxu1 %v2330_v13 }
 0x736   : > { %v1066_v33 = vpop.f32.mrf.mxu1 }
 0x737   : > { %v1072_v35 = vpack.c.bf16 %v1066_v33, %v1066_v33 }
 0x738   : > { %v2038_v36 = vpop.f32.mrf.mxu1 }
 0x739   : > { %2043 = vmatmul.mubr.msk.bf16.vlgmr.msra.gmra.mxu0 %vm802_vm6, %v1072_v35 }
 0x73a   : > { %2053 = vmatpush3.bf16.msra.mxu0 %v2179_v34  ;;  %v1069_v37 = vpop.f32.mrf.mxu1  ;;  %2056 = vmatprep.mubr.msk.bf16.mxu0 %vm2331_vm0, %v2330_v13 }
 0x73b   : > { %2054 = vmatprep.subr.bf16.mxu0 %v2330_v13 }
 0x73c   : > { %v2039_v39 = vpop.f32.mrf.mxu1 }
 0x73e   : > { %2055 = vmatpush3.bf16.msra.mxu0 %v2180_v38  ;;  %v2647_v40 = vpop.f32.mrf.mxu1 }
 0x73f   : > { %2066 = vmatprep.subr.bf16.mxu0 %v2330_v13 }
 0x740   : > { %v2050_v41 = vpop.f32.mrf.mxu1 }
 0x741   : > { %2057 = vmatmul.mubr.msk.bf16.vlgmr.msra.gmra.mxu0 %vm756_vm5, %v2583_v27 }
 0x742   : > { %v1162_v42 = vpop.f32.mrf.mxu1  ;;  %2068 = vmatprep.mubr.msk.bf16.mxu0 %vm2331_vm0, %v2330_v13  ;;  %2067 = vmatpush3.bf16.xpose.msra.mxu0 %v1920_v5 }
 0x743   : > { %2078 = vmatprep.subr.bf16.mxu0 %v2330_v13 }
 0x744   : > { %v2051_v44 = vpop.f32.mrf.mxu1 }
 0x7f9   : > { %v2657_v47 = vpop.f32.mrf.mxu0 }
 0x7fa   : > { %v1160_v32 = vadd.f32 %v2647_v40, %v2657_v47  ;;  %v1932_v47 = vld [vmem:[%s2529_s23 + $0xc] sm:$0xf]  ;;  %s2259_s23 = scalar_lea.vmem %s2258_s19, 128 }
 0x7fb   : > { %v2044_v48 = vpop.f32.mrf.mxu0  ;;  %p2261_p3 = scmp.lt.s32.totalorder %s2259_s23, %s2253_s30 }
 0x7fd   : > { %v1116_v50 = vpop.f32.mrf.mxu0  ;;  %p2262_p8 = por %p2261_p3, %p2260_p7 }
 0x7fe   : > { %v1389_v50 = vld [vmem:[#allocation8 + $0xc] sm:$0xf] }
 0x7ff   : > { %v2045_v52 = vpop.f32.mrf.mxu0  ;;  %p2263_p9 = pnand %p2262_p8, %p2256_p0 }
 0x801   : > { %v1225_v53 = vpop.f32.mrf.mxu0 }
 0x802   : > { %v1231_v54 = vadd.f32 %v1225_v53, %v1178_v51  ;;  %v1550_v51 = vsel %vm806_vm4, %v1389_v50, 0 }
 0x803   : > { %v2058_v55 = vpop.f32.mrf.mxu0 }
 0x804   : > { %v1232_v56 = vpack.c.bf16 %v1231_v54, %v1231_v54 }
 0x805   : > { %v1228_v57 = vpop.f32.mrf.mxu0 }
 0x806   : > { %2063 = vmatmul.mubr.msk.bf16.vlgmr.msra.gmra.mxu1 %vm802_vm6, %v1232_v56 }
 0x807   : > { %v2059_v58 = vpop.f32.mrf.mxu0  ;;  %2074 = vmatprep.mubr.msk.bf16.mxu1 %vm2331_vm0, %v2330_v13  ;;  %2073 = vmatpush3.bf16.msra.mxu1 %v1336_v7 }
 0x808   : > { %2086 = vmatprep.subr.bf16.mxu1 %v2330_v13 }
 0x8c6   : > { %v1273_v59 = vpop.f32.mrf.mxu1 }
 0x8c7   : > { %v1279_v60 = vmul.f32 0.35355338, %v1273_v59 }
 0x8c8   : > { %v2064_v61 = vpop.f32.mrf.mxu1 }
 0x8c9   : > { %v1280_v62 = vsel %vm2608_vm7, -1e+30, %v1279_v60 }
 0x8ca   : > { %1281 = vmax.xlane.f32.xlu1 %v1280_v62  ;;  %v1276_v63 = vpop.f32.mrf.mxu1 }
 0x8cc   : > { %v2065_v0 = vpop.f32.mrf.mxu1 }
 0x953   : > { %v1282_v1 = vpop.xlane.xlu1 %1281 }
 0x954   : > { %v1283_v2 = vsub.f32 %v1280_v62, %v1282_v1 }
 0x956   : > { %v1284_v3 = vmul.f32 1.442695, %v1283_v2 }
 0x958   : > { %2191 = vpow2.f32 %v1284_v3 }
 0x965   : > { %v2192_v4 = vpop.eup %2191 }
 0x966   : > { %1286 = vadd.xlane.f32.xlu1 %v2192_v4 }
 0x9ef   : > { %v1287_v8 = vpop.xlane.xlu1 %1286 }
 0x9f0   : > { %2193 = vrcp.f32 %v1287_v8 }
 0x9fd   : > { %v2194_v9 = vpop.eup %2193 }
 0x9fe   : > { %v1289_v10 = vmul.f32 %v2194_v9, %v2192_v4 }
 0xa00   : > { %v1290_v12 = vpack.c.bf16 %v1289_v10, %v1289_v10 }
 0xa02   : > { %2069 = vmatmul.mubr.bf16.vlgmr.msra.gmra.mxu0 %v1290_v12 }
 0xa03   : > { %2079 = vmatpush3.bf16.msra.mxu0 %v2181_v11  ;;  %2082 = vmatprep.mubr.msk.bf16.mxu0 %vm2331_vm0, %v2330_v13 }
 0xa04   : > { %2080 = vmatprep.subr.bf16.mxu0 %v2330_v13 }
 0xa07   : > { %2081 = vmatpush3.bf16.msra.mxu0 %v2182_v14 }
 0xa08   : > { %2092 = vmatprep.subr.bf16.mxu0 %v2330_v13 }
 0xa0a   : > { %2083 = vmatmul.mubr.msk.bf16.vlgmr.msra.gmra.mxu0 %vm756_vm5, %v2583_v27 }
 0xa0b   : > { %2094 = vmatprep.mubr.msk.bf16.mxu0 %vm2331_vm0, %v2330_v13  ;;  %2093 = vmatpush3.bf16.xpose.msra.mxu0 %v1932_v47 }
 0xa0c   : > { %2104 = vmatprep.subr.bf16.mxu0 %v2330_v13 }
 0xac2   : > { %v1325_v17 = vpop.f32.mrf.mxu0 }
 0xac3   : > { %v1331_v18 = vpack.c.bf16 %v1325_v17, %v1325_v17 }
 0xac4   : > { %v2070_v22 = vpop.f32.mrf.mxu0 }
 0xac5   : > { %2075 = vmatmul.mubr.msk.bf16.vlgmr.msra.gmra.mxu1 %vm802_vm6, %v1331_v18 }
 0xac6   : > { %v1328_v23 = vpop.f32.mrf.mxu0  ;;  %2087 = vmatpush3.bf16.msra.mxu1 %v1451_v20  ;;  %2088 = vmatprep.mubr.msk.bf16.mxu1 %vm2331_vm0, %v2330_v13 }
 0xac7   : > { %2098 = vmatprep.subr.bf16.mxu1 %v2330_v13 }
 0xac8   : > { %v2071_v27 = vpop.f32.mrf.mxu0 }
 0xaca   : > { %v1439_v25 = vpop.f32.mrf.mxu0 }
 0xacb   : > { %v1445_v26 = vadd.f32 %v1439_v25, %v1392_v24 }
 0xacc   : > { %v2084_v28 = vpop.f32.mrf.mxu0 }
 0xacd   : > { %v1446_v29 = vpack.c.bf16 %v1445_v26, %v1445_v26 }
 0xace   : > { %v1442_v30 = vpop.f32.mrf.mxu0 }
 0xacf   : > { %2089 = vmatmul.mubr.msk.bf16.vlgmr.msra.gmra.mxu1 %vm802_vm6, %v1446_v29 }
 0xad0   : > { %v2085_v31 = vpop.f32.mrf.mxu0  ;;  %2100 = vmatprep.mubr.msk.bf16.mxu1 %vm2331_vm0, %v2330_v13  ;;  %2099 = vmatpush3.bf16.msra.mxu1 %v1550_v51 }
 0xb85   : > { %v1372_v33 = vpop.f32.mrf.mxu1 }
 0xb86   : > { %v1378_v34 = vadd.f32 %v1372_v33, %v1160_v32 }
 0xb87   : > { %v2076_v35 = vpop.f32.mrf.mxu1 }
 0xb89   : > { %v1375_v36 = vpop.f32.mrf.mxu1 }
 0xb8b   : > { %v2077_v37 = vpop.f32.mrf.mxu1 }
 0xb8f   : > { %v1487_v38 = vpop.f32.mrf.mxu1 }
 0xb90   : > { %v1493_v39 = vmul.f32 0.35355338, %v1487_v38 }
 0xb91   : > { %v2090_v41 = vpop.f32.mrf.mxu1 }
 0xb92   : > { %v1494_v42 = vsel %vm2608_vm7, -1e+30, %v1493_v39 }
 0xb93   : > { %1495 = vmax.xlane.f32.xlu1 %v1494_v42  ;;  %v1490_v44 = vpop.f32.mrf.mxu1 }
 0xb95   : > { %v2091_v45 = vpop.f32.mrf.mxu1 }
 0xc1c   : > { %v1496_v46 = vpop.xlane.xlu1 %1495 }
 0xc1d   : > { %v1497_v48 = vsub.f32 %v1494_v42, %v1496_v46 }
 0xc1f   : > { %v1498_v49 = vmul.f32 1.442695, %v1497_v48 }
 0xc21   : > { %2195 = vpow2.f32 %v1498_v49 }
 0xc2e   : > { %v2196_v40 = vpop.eup %2195 }
 0xc2f   : > { %1500 = vadd.xlane.f32.xlu1 %v2196_v40 }
 0xcb8   : > { %v1501_v52 = vpop.xlane.xlu1 %1500 }
 0xcb9   : > { %2197 = vrcp.f32 %v1501_v52 }
 0xcc6   : > { %v2198_v53 = vpop.eup %2197 }
 0xcc7   : > { %v1503_v54 = vmul.f32 %v2198_v53, %v2196_v40 }
 0xcc9   : > { %v1504_v55 = vpack.c.bf16 %v1503_v54, %v1503_v54 }
 0xccb   : > { %2095 = vmatmul.mubr.bf16.vlgmr.msra.gmra.mxu0 %v1504_v55 }
 0xccc   : > { %2105 = vmatpush3.bf16.msra.mxu0 %v2561_v16  ;;  %2108 = vmatprep.mubr.msk.bf16.mxu0 %vm2331_vm0, %v2330_v13  ;;  %v1943_v16 = vld [vmem:[%s2762_s8] ss:$0 sm:$0xff] }
 0xccd   : > { %2106 = vmatprep.subr.bf16.mxu0 %v2330_v13 }
 0xcd0   : > { %2107 = vmatpush3.bf16.msra.mxu0 %v2568_v19 }
 0xd8b   : > { %v1539_v56 = vpop.f32.mrf.mxu0 }
 0xd8c   : > { %v1545_v57 = vpack.c.bf16 %v1539_v56, %v1539_v56 }
 0xd8d   : > { %v2096_v58 = vpop.f32.mrf.mxu0 }
 0xd8e   : > { %2101 = vmatmul.mubr.msk.bf16.vlgmr.msra.gmra.mxu1 %vm802_vm6, %v1545_v57 }
 0xd8f   : > { %v1542_v59 = vpop.f32.mrf.mxu0 }
 0xd91   : > { %v2097_v60 = vpop.f32.mrf.mxu0 }
 0xe4e   : > { %v1586_v61 = vpop.f32.mrf.mxu1 }
 0xe4f   : > { %v1592_v62 = vadd.f32 %v1586_v61, %v1378_v34 }
 0xe50   : > { %v2102_v63 = vpop.f32.mrf.mxu1 }
 0xe51   : > { %v1600_v0 = vadd.f32 %v1943_v16, %v1592_v62 }
 0xe52   : > { %v1589_v1 = vpop.f32.mrf.mxu1 }
 0xe53   : > { %v1601_v13 = vpack.c.bf16 %v1600_v0, %v1600_v0 }
 0xe54   : > { %v2103_v2 = vpop.f32.mrf.mxu1 }
 0xe55   : > { %2109 = vmatmul.mubr.msk.bf16.vlgmr.msra.gmra.mxu0 %vm756_vm5, %v1601_v13 }
 0xf15   : > { %v1639_v19 = vpop.f32.mrf.mxu0 }
 0xf16   : > { %v1645_v3 = vmul.f32 0.17677669, %v1639_v19 }
 0xf17   : > { %v2110_v4 = vpop.f32.mrf.mxu0 }
 0xf18   : > { %2199 = vtanh.f32 %v1645_v3 }
 0xf19   : > { %v1642_v5 = vpop.f32.mrf.mxu0 }
 0xf1b   : > { %v2111_v6 = vpop.f32.mrf.mxu0 }
 0xf25   : > { %v2200_v7 = vpop.eup %2199 }
 0xf26   : > { %v1647_v8 = vmul.f32 10.0, %v2200_v7 }
 0xf28   : > { %v1648_v9 = vsel %vm2608_vm7, -1e+30, %v1647_v8 }
 0xf29   : > { %1651 = vmax.xlane.f32.xlu1 %v1648_v9  ;;  %v1649_v10 = vpack.c.bf16 %v1648_v9, %v1648_v9 }
 0xf2b   : > { %1650 = vst [vmem:[%s644_s28] sm:$0xf] %v1649_v10 }
 0xfb2   : > { %v1652_v11 = vpop.xlane.xlu1 %1651 }
 0xfb3   : > { %vm1653_vm8 = vcmp.ge.f32.partialorder %v1648_v9, %v1652_v11 }
 0xfb4   : > { %v1654_v12 = vsel %vm1653_vm8, %v2573_v21, 128 }
 0xfb5   : > { %v1656_v14 = vshra.s32 %v1654_v12, 16  ;;  %v1655_v17 = vand.u32 65535, %v1654_v12 }
 0xfb7   : > { %v1658_v15 = vcvt.s32.f32 %v1656_v14  ;;  %v1657_v20 = vcvt.s32.f32 %v1655_v17 }
 0xfb9   : > { %1659 = vmin.xlane.f32.xlu1 %v1658_v15 }
0x1042   : > { %v1660_v18 = vpop.xlane.xlu1 %1659 }
0x1043   : > { %vm1661_vm9 = vcmp.eq.f32.partialorder %v1658_v15, %v1660_v18 }
0x1044   : > { %v1662_v43 = vsel %vm1661_vm9, %v1657_v20, inf }
0x1045   : > { %1663 = vmin.xlane.f32.xlu0 %v1662_v43 }
0x1046   : > { %2266 = shalt.err (!%p2263_p9)
}
0x1047   : > { %s2267_s17 = scalar_lea.hbm %s1687_s22, 64  ;;  %s2271_s28 = scalar_lea.hbm %s2763_s9, 128 }
0x1048   : > { %p2268_p6 = scmp.ne.s32.totalorder %s1687_s22, %s2267_s17  ;;  %p2272_p5 = scmp.lt.s32.totalorder %s1687_s22, %s2763_s9 }
0x1049   : > { %p2273_p13 = scmp.lt.s32.totalorder %s2271_s28, %s2267_s17 }
0x104a   : > { %p2269_p11 = pnand %p2268_p6, %p2787_p1 }
0x104b   : > { %p2274_p10 = por %p2273_p13, %p2272_p5 }
0x104c   : > { %p2270_p4 = pneg %p2269_p11 }
0x104e   : > { %p2275_p12 = pnand %p2274_p10, %p2270_p4 }
0x1050   : > { %2278 = shalt.err (!%p2275_p12)
}
0x1051   : > { %2118 = dma.vmem_to_hbm [thread:$0]  (%p2787_p1), %s1690_s20, 64, %s1687_s22, %s1672_s26   ;;  %v1666_v21 = vcvt.f32.s32 %v1660_v18  ;;  %vm1669_vm10 = vcmask 7168  }
0x1052   : > { %s662_s12 = scalar_lea.vmem %s2764_s10, %s1894_s11 }
0x1053   : > { %v1667_v23 = vshll.u32 %v1666_v21, 16 }
0x10ce   : > { %v1664_v22 = vpop.xlane.xlu0 %1663 }
0x10cf   : > { %v1665_v24 = vcvt.f32.s32 %v1664_v22 }
0x10d1   : > { %v1668_v27 = vadd.s32 %v1667_v23, %v1665_v24 }
0x10d3   : > { %1670 = vst.msk [vmem:[%s662_s12] sm:$0xff] %vm1669_vm10, %v1668_v27 }
0x10d4 PF: > { %s2788_s19 = sld [smem:[#allocation16_spill]]  ;;  %s1704_s23 = sand.u32 1, %s2309_s13  }
0x10d5   : > { %p2790_p0 = scmp.ge.s32.totalorder %s2321_s16, 2  ;;  %s1705_s25 = scalar_lea.sflag [#allocation7], %s1704_s23 }
0x10da   : > { %p2789_p2 = scmp.ne.s32.totalorder %s2788_s19, 0 }
0x10dc   : > { %p2125_p1 = pnand %p2790_p0, %p2789_p2 }
0x10de   : > { %p2126_p7 = pneg %p2125_p1 }
0x10e0   : > { %2304 = dma.done.wait (%p2126_p7), %s1705_s25, 64  }
0x10e1   : > { %2306 = vsyncadd (%p2126_p7), %s1705_s25, 4294967232  ;;  %s2791_s16 = sld [smem:[#allocation14_spill]]  ;;  %s2793_s13 = smov %s2313_s14 }
0x10e2   : > { %s2792_s29 = sld [smem:[#allocation15_spill]]  ;;  %s2794_s14 = smov %s2317_s15 }
0x10e7   : > { %p25_p3 = scmp.ge.s32.totalorder %s2791_s16, 4  }
0x10e8   : > { %s2795_s15 = smov %s2792_s29 }
0x10e9   :  { %27 = sbr.rel (!%p25_p3) target bundleno = 8 (0x8), region = 285 }
0x10ee   :  { %1717 = vsyncpa [#allocation6], 1 }
0x10ef   :  { %1719 = vsyncpa [#allocation6 + $0x1], 1 }
0x10f0   :  { %1720 = vsyncpa [#allocation9], 1 }
0x10f1   :  { %1721 = vsyncpa [#allocation7], 1 }
0x10f2   :  { %1723 = vsyncpa [#allocation7 + $0x1], 1 }

</bundles_post_ra>
